<compile_context>
chip_gen: v5e
topology: v5e:2x2
jax: 0.10.0
libtpu: 0.0.40
codegen_flags: <defaults>
</compile_context>

<pallas_src>
import functools

import jax
import jax.numpy as jnp
from jax.experimental import pallas as pl
from jax.experimental.pallas import tpu as pltpu


# ---------------------------------------------------------------------------
# helpers
# ---------------------------------------------------------------------------
def _round_up(x, m):
    return ((x + m - 1) // m) * m


def _pick_tile(dim, unit, max_tile):
    """Pick (tile, padded_dim): tile is a multiple of `unit`, <= max_tile,
    chosen to minimize padding (largest tile wins ties)."""
    p0 = _round_up(dim, unit)
    if p0 <= max_tile:
        return p0, p0
    best_t, best_p = None, None
    t = max_tile
    while t >= unit:
        p = _round_up(dim, t)
        if best_p is None or p < best_p:
            best_t, best_p = t, p
        t -= unit
    return best_t, best_p


# ---------------------------------------------------------------------------
# Pallas kernel: fused  out = [relu](x @ w + b), tiled over (M, N, K)
# ---------------------------------------------------------------------------
def _fused_matmul_kernel(x_ref, w_ref, b_ref, o_ref, acc_ref, *, apply_relu):
    k = pl.program_id(2)

    @pl.when(k == 0)
    def _():
        # bias folded into accumulator init (no per-K broadcast+add)
        acc_ref[...] = jnp.broadcast_to(b_ref[...], acc_ref.shape)

    acc_ref[...] += jnp.dot(
        x_ref[...], w_ref[...], preferred_element_type=jnp.float32
    )

    @pl.when(k == pl.num_programs(2) - 1)
    def _():
        r = acc_ref[...]
        if apply_relu:
            r = jnp.maximum(r, 0.0)
        o_ref[...] = r.astype(o_ref.dtype)


def fused_matmul(x, w, b, *, apply_relu, out_dtype=jnp.float32):
    """x: (M, K), w: (K, N), b: (N,) -> (M, N) in out_dtype.

    Operands are cast to bf16 (MXU-friendly), accumulation is f32.
    M/K/N are padded so every block is (8,128)-aligned and output stores are
    lane-dense; the padding is sliced off before returning.
    """
    M, K = x.shape
    K2, N = w.shape
    assert K == K2

    tm, Mp = _pick_tile(M, 8, 256)
    tn, Np = _pick_tile(N, 128, 256)
    tk, Kp = _pick_tile(K, 128, 512)

    xb = jnp.pad(x.astype(jnp.bfloat16), ((0, Mp - M), (0, Kp - K)))
    wb = jnp.pad(w.astype(jnp.bfloat16), ((0, Kp - K), (0, Np - N)))
    bb = jnp.pad(b.astype(jnp.float32), (0, Np - N)).reshape(1, Np)

    grid = (Mp // tm, Np // tn, Kp // tk)

    out = pl.pallas_call(
        functools.partial(_fused_matmul_kernel, apply_relu=apply_relu),
        out_shape=jax.ShapeDtypeStruct((Mp, Np), out_dtype),
        grid_spec=pltpu.PrefetchScalarGridSpec(
            num_scalar_prefetch=0,
            grid=grid,
            in_specs=[
                pl.BlockSpec((tm, tk), lambda i, j, k: (i, k)),
                pl.BlockSpec((tk, tn), lambda i, j, k: (k, j)),
                pl.BlockSpec((1, tn), lambda i, j, k: (0, j)),
            ],
            out_specs=pl.BlockSpec((tm, tn), lambda i, j, k: (i, j)),
            scratch_shapes=[pltpu.VMEM((tm, tn), jnp.float32)],
        ),
        compiler_params=pltpu.CompilerParams(
            dimension_semantics=("parallel", "parallel", "arbitrary"),
            vmem_limit_bytes=32 * 1024 * 1024,
        ),
        cost_estimate=pl.CostEstimate(
            flops=2 * Mp * Kp * Np,
            transcendentals=0,
            bytes_accessed=2 * (Mp * Kp + Kp * Np)
            + Mp * Np * jnp.dtype(out_dtype).itemsize,
        ),
    )(xb, wb, bb)
    return out[:M, :N]


# ---------------------------------------------------------------------------
# Conv2d (valid padding, square stride) via NHWC im2col + fused Pallas matmul
# ---------------------------------------------------------------------------
def conv2d_nhwc(x, wmat, b, kh, kw, stride, *, apply_relu, out_dtype=jnp.bfloat16):
    """x: (B, H, W, C) NHWC; wmat: (KH*KW*C, O) pre-reshaped; b: (O,)."""
    B, H, W, C = x.shape
    OH = (H - kh) // stride + 1
    OW = (W - kw) // stride + 1

    cols = [
        x[:, i:i + stride * OH:stride, j:j + stride * OW:stride, :]
        for i in range(kh)
        for j in range(kw)
    ]
    patches = jnp.stack(cols, axis=3).reshape(B * OH * OW, kh * kw * C)

    out = fused_matmul(patches, wmat, b, apply_relu=apply_relu, out_dtype=out_dtype)
    O = wmat.shape[1]
    return out.reshape(B, OH, OW, O)


# ---------------------------------------------------------------------------
# AtariDQN forward (eval mode: Dropout = identity)
# ---------------------------------------------------------------------------
def atari_dqn_forward(prepared, x):
    # single NCHW -> NHWC transpose of the input; everything else stays NHWC
    x = jnp.transpose(x, (0, 2, 3, 1)).astype(jnp.bfloat16)
    h = conv2d_nhwc(x, prepared["c1_wm"], prepared["c1_b"], 8, 8, 4, apply_relu=True)
    h = conv2d_nhwc(h, prepared["c2_wm"], prepared["c2_b"], 4, 4, 2, apply_relu=True)
    h = conv2d_nhwc(h, prepared["c3_wm"], prepared["c3_b"], 3, 3, 1, apply_relu=True)

    B = x.shape[0]
    flat = h.reshape(B, -1)  # NHWC flatten; fc1 weight was pre-permuted to match
    h = fused_matmul(flat, prepared["fc1_wm"], prepared["fc1_b"],
                     apply_relu=True, out_dtype=jnp.bfloat16)
    q = fused_matmul(h, prepared["fc2_wm"], prepared["fc2_b"],
                     apply_relu=False, out_dtype=jnp.float32)
    return q


# ---------------------------------------------------------------------------
# Parameter construction (PyTorch layouts) + one-time kernel-layout conversion
# ---------------------------------------------------------------------------
def _out_sz(s, k, st):
    return (s - k) // st + 1


def init_params(key, input_shape, n_actions):
    """Synthetic weights in PyTorch layouts (conv: (O,C,KH,KW), fc: (out,in))."""
    C, H, W = input_shape

    def uniform(k, shape, fan_in):
        bound = 1.0 / jnp.sqrt(jnp.float32(fan_in))
        return jax.random.uniform(k, shape, jnp.float32, -bound, bound)

    ks = jax.random.split(key, 10)
    conv1_w = uniform(ks[0], (32, C, 8, 8), C * 8 * 8)
    conv1_b = uniform(ks[1], (32,), C * 8 * 8)
    conv2_w = uniform(ks[2], (64, 32, 4, 4), 32 * 4 * 4)
    conv2_b = uniform(ks[3], (64,), 32 * 4 * 4)
    conv3_w = uniform(ks[4], (64, 64, 3, 3), 64 * 3 * 3)
    conv3_b = uniform(ks[5], (64,), 64 * 3 * 3)

    oh = _out_sz(_out_sz(_out_sz(H, 8, 4), 4, 2), 3, 1)
    ow = _out_sz(_out_sz(_out_sz(W, 8, 4), 4, 2), 3, 1)
    conv_out_size = 64 * oh * ow

    fc1_w = uniform(ks[6], (512, conv_out_size), conv_out_size)
    fc1_b = uniform(ks[7], (512,), conv_out_size)
    fc2_w = uniform(ks[8], (n_actions, 512), 512)
    fc2_b = uniform(ks[9], (n_actions,), 512)

    return {
        "conv1_w": conv1_w, "conv1_b": conv1_b,
        "conv2_w": conv2_w, "conv2_b": conv2_b,
        "conv3_w": conv3_w, "conv3_b": conv3_b,
        "fc1_w": fc1_w, "fc1_b": fc1_b,
        "fc2_w": fc2_w, "fc2_b": fc2_b,
    }


def prepare_params(params, input_shape):
    """One-time conversion of PyTorch-layout weights to kernel-friendly layouts
    (no per-call transposes in the forward path)."""
    C, H, W = input_shape

    def conv_mat(w):  # (O, C, KH, KW) -> (KH*KW*C, O), matches NHWC im2col order
        O, Ci, KH, KW = w.shape
        return w.transpose(2, 3, 1, 0).reshape(KH * KW * Ci, O).astype(jnp.bfloat16)

    oh = _out_sz(_out_sz(_out_sz(H, 8, 4), 4, 2), 3, 1)
    ow = _out_sz(_out_sz(_out_sz(W, 8, 4), 4, 2), 3, 1)

    # fc1 weight: PyTorch input order is NCHW-flatten (C, OH, OW); permute once
    # to NHWC-flatten (OH, OW, C) and pre-transpose to (in, out).
    fc1_wm = (
        params["fc1_w"].reshape(512, 64, oh, ow)
        .transpose(0, 2, 3, 1)
        .reshape(512, -1)
        .T.astype(jnp.bfloat16)
    )
    fc2_wm = params["fc2_w"].T.astype(jnp.bfloat16)  # (512, n_actions)

    return {
        "c1_wm": conv_mat(params["conv1_w"]), "c1_b": params["conv1_b"].astype(jnp.float32),
        "c2_wm": conv_mat(params["conv2_w"]), "c2_b": params["conv2_b"].astype(jnp.float32),
        "c3_wm": conv_mat(params["conv3_w"]), "c3_b": params["conv3_b"].astype(jnp.float32),
        "fc1_wm": fc1_wm, "fc1_b": params["fc1_b"].astype(jnp.float32),
        "fc2_wm": fc2_wm, "fc2_b": params["fc2_b"].astype(jnp.float32),
    }


if __name__ == "__main__":
    # Small but architecture-consistent shapes:
    # input (B=2, C=4, 36, 36) -> conv1: 8x8 -> conv2: 3x3 -> conv3: 1x1
    input_shape = (4, 36, 36)
    n_actions = 6
    batch = 2

    key = jax.random.PRNGKey(0)
    k_params, k_x = jax.random.split(key)
    params = init_params(k_params, input_shape, n_actions)
    prepared = prepare_params(params, input_shape)
    x = jax.random.normal(k_x, (batch,) + input_shape, dtype=jnp.float32)

    fwd = jax.jit(atari_dqn_forward)
    q_values = fwd(prepared, x)
    q_values = jax.block_until_ready(q_values)
    assert q_values.shape == (batch, n_actions), q_values.shape
    print("KERNEL_OK")
</pallas_src>

<mosaic_0001>
module attributes {stable_mosaic.version = 11 : i64} {
  func.func @_fused_matmul_kernel(%arg0: i32, %arg1: i32, %arg2: i32, %arg3: memref<128x256xbf16, #tpu.memory_space<vmem>>, %arg4: memref<256x128xbf16, #tpu.memory_space<vmem>>, %arg5: memref<1x128xf32, #tpu.memory_space<vmem>>, %arg6: memref<128x128xbf16, #tpu.memory_space<vmem>>, %arg7: memref<128x128xf32, #tpu.memory_space<vmem>>) attributes {dimension_semantics = [#tpu.dimension_semantics<parallel>, #tpu.dimension_semantics<parallel>, #tpu.dimension_semantics<arbitrary>], iteration_bounds = array<i64: 1, 1, 1>, scalar_prefetch = 0 : i64, scratch_operands = 1 : i64, tpu.core_type = #tpu.core_type<tc>, window_params = [{transform_indices = @transform_0, window_bounds = array<i64: 128, 256>}, {transform_indices = @transform_1, window_bounds = array<i64: 256, 128>}, {transform_indices = @transform_2, window_bounds = array<i64: 1, 128>}, {transform_indices = @transform_3, window_bounds = array<i64: 128, 128>}]} {
    %c0_i32 = arith.constant 0 : i32
    %0 = arith.cmpi eq, %arg2, %c0_i32 : i32
    %1 = arith.extui %0 : i1 to i32
    %c0_i32_0 = arith.constant 0 : i32
    %2 = arith.cmpi ne, %1, %c0_i32_0 : i32
    scf.if %2 {
      %c0_10 = arith.constant 0 : index
      %c0_11 = arith.constant 0 : index
      %12 = vector.load %arg5[%c0_10, %c0_11] : memref<1x128xf32, #tpu.memory_space<vmem>>, vector<1x128xf32>
      %13 = vector.shape_cast %12 : vector<1x128xf32> to vector<1x128xf32>
      %14 = vector.broadcast %13 : vector<1x128xf32> to vector<128x128xf32>
      %c0_12 = arith.constant 0 : index
      %c0_13 = arith.constant 0 : index
      %15 = vector.load %arg7[%c0_12, %c0_13] : memref<128x128xf32, #tpu.memory_space<vmem>>, vector<128x128xf32>
      tpu.vector_store %arg7[%c0_12, %c0_13], %14 {strides = array<i32>} : memref<128x128xf32, #tpu.memory_space<vmem>>, vector<128x128xf32>,
    } else {
    }
    %c0 = arith.constant 0 : index
    %c0_1 = arith.constant 0 : index
    %3 = vector.load %arg7[%c0, %c0_1] : memref<128x128xf32, #tpu.memory_space<vmem>>, vector<128x128xf32>
    %c0_2 = arith.constant 0 : index
    %c0_3 = arith.constant 0 : index
    %4 = vector.load %arg3[%c0_2, %c0_3] : memref<128x256xbf16, #tpu.memory_space<vmem>>, vector<128x256xbf16>
    %c0_4 = arith.constant 0 : index
    %c0_5 = arith.constant 0 : index
    %5 = vector.load %arg4[%c0_4, %c0_5] : memref<256x128xbf16, #tpu.memory_space<vmem>>, vector<256x128xbf16>
    %cst = arith.constant dense<0.000000e+00> : vector<128x128xf32>
    %6 = tpu.matmul %4, %5, %cst {dimension_numbers = #tpu.dot_dimension_numbers<[1], [0], [0], [1], [0, 0, 1, 1], [], []>} : vector<128x256xbf16>, vector<256x128xbf16>, vector<128x128xf32> -> vector<128x128xf32>
    %7 = arith.addf %3, %6 : vector<128x128xf32>
    %c0_6 = arith.constant 0 : index
    %c0_7 = arith.constant 0 : index
    %8 = vector.load %arg7[%c0_6, %c0_7] : memref<128x128xf32, #tpu.memory_space<vmem>>, vector<128x128xf32>
    tpu.vector_store %arg7[%c0_6, %c0_7], %7 {strides = array<i32>} : memref<128x128xf32, #tpu.memory_space<vmem>>, vector<128x128xf32>,
    %c0_i32_8 = arith.constant 0 : i32
    %9 = arith.cmpi eq, %arg2, %c0_i32_8 : i32
    %10 = arith.extui %9 : i1 to i32
    %c0_i32_9 = arith.constant 0 : i32
    %11 = arith.cmpi ne, %10, %c0_i32_9 : i32
    scf.if %11 {
      %c0_10 = arith.constant 0 : index
      %c0_11 = arith.constant 0 : index
      %12 = vector.load %arg7[%c0_10, %c0_11] : memref<128x128xf32, #tpu.memory_space<vmem>>, vector<128x128xf32>
      %cst_12 = arith.constant 0.000000e+00 : f32
      %13 = vector.broadcast %cst_12 : f32 to vector<128x128xf32>
      %14 = arith.maximumf %12, %13 : vector<128x128xf32>
      %15 = arith.truncf %14 : vector<128x128xf32> to vector<128x128xbf16>
      %c0_13 = arith.constant 0 : index
      %c0_14 = arith.constant 0 : index
      %16 = vector.load %arg6[%c0_13, %c0_14] : memref<128x128xbf16, #tpu.memory_space<vmem>>, vector<128x128xbf16>
      tpu.vector_store %arg6[%c0_13, %c0_14], %15 {strides = array<i32>} : memref<128x128xbf16, #tpu.memory_space<vmem>>, vector<128x128xbf16>,
    } else {
    }
    return
  }
  func.func @transform_0(%arg0: i32, %arg1: i32, %arg2: i32) -> (i32, i32) {
    %c0_i32 = arith.constant 0 : i32
    return %arg0, %arg2 : i32, i32
  }
  func.func @transform_1(%arg0: i32, %arg1: i32, %arg2: i32) -> (i32, i32) {
    %c0_i32 = arith.constant 0 : i32
    return %arg2, %arg1 : i32, i32
  }
  func.func @transform_2(%arg0: i32, %arg1: i32, %arg2: i32) -> (i32, i32) {
    %c0_i32 = arith.constant 0 : i32
    %c0_i32_0 = arith.constant 0 : i32
    return %c0_i32, %arg1 : i32, i32
  }
  func.func @transform_3(%arg0: i32, %arg1: i32, %arg2: i32) -> (i32, i32) {
    %c0_i32 = arith.constant 0 : i32
    return %arg0, %arg1 : i32, i32
  }
}

module attributes {stable_mosaic.version = 11 : i64} {
  func.func @_fused_matmul_kernel(%arg0: i32, %arg1: i32, %arg2: i32, %arg3: memref<24x512xbf16, #tpu.memory_space<vmem>>, %arg4: memref<512x128xbf16, #tpu.memory_space<vmem>>, %arg5: memref<1x128xf32, #tpu.memory_space<vmem>>, %arg6: memref<24x128xbf16, #tpu.memory_space<vmem>>, %arg7: memref<24x128xf32, #tpu.memory_space<vmem>>) attributes {dimension_semantics = [#tpu.dimension_semantics<parallel>, #tpu.dimension_semantics<parallel>, #tpu.dimension_semantics<arbitrary>], iteration_bounds = array<i64: 1, 1, 1>, scalar_prefetch = 0 : i64, scratch_operands = 1 : i64, tpu.core_type = #tpu.core_type<tc>, window_params = [{transform_indices = @transform_0, window_bounds = array<i64: 24, 512>}, {transform_indices = @transform_1, window_bounds = array<i64: 512, 128>}, {transform_indices = @transform_2, window_bounds = array<i64: 1, 128>}, {transform_indices = @transform_3, window_bounds = array<i64: 24, 128>}]} {
    %c0_i32 = arith.constant 0 : i32
    %0 = arith.cmpi eq, %arg2, %c0_i32 : i32
    %1 = arith.extui %0 : i1 to i32
    %c0_i32_0 = arith.constant 0 : i32
    %2 = arith.cmpi ne, %1, %c0_i32_0 : i32
    scf.if %2 {
      %c0_10 = arith.constant 0 : index
      %c0_11 = arith.constant 0 : index
      %12 = vector.load %arg5[%c0_10, %c0_11] : memref<1x128xf32, #tpu.memory_space<vmem>>, vector<1x128xf32>
      %13 = vector.shape_cast %12 : vector<1x128xf32> to vector<1x128xf32>
      %14 = vector.broadcast %13 : vector<1x128xf32> to vector<24x128xf32>
      %c0_12 = arith.constant 0 : index
      %c0_13 = arith.constant 0 : index
      %15 = vector.load %arg7[%c0_12, %c0_13] : memref<24x128xf32, #tpu.memory_space<vmem>>, vector<24x128xf32>
      tpu.vector_store %arg7[%c0_12, %c0_13], %14 {strides = array<i32>} : memref<24x128xf32, #tpu.memory_space<vmem>>, vector<24x128xf32>,
    } else {
    }
    %c0 = arith.constant 0 : index
    %c0_1 = arith.constant 0 : index
    %3 = vector.load %arg7[%c0, %c0_1] : memref<24x128xf32, #tpu.memory_space<vmem>>, vector<24x128xf32>
    %c0_2 = arith.constant 0 : index
    %c0_3 = arith.constant 0 : index
    %4 = vector.load %arg3[%c0_2, %c0_3] : memref<24x512xbf16, #tpu.memory_space<vmem>>, vector<24x512xbf16>
    %c0_4 = arith.constant 0 : index
    %c0_5 = arith.constant 0 : index
    %5 = vector.load %arg4[%c0_4, %c0_5] : memref<512x128xbf16, #tpu.memory_space<vmem>>, vector<512x128xbf16>
    %cst = arith.constant dense<0.000000e+00> : vector<24x128xf32>
    %6 = tpu.matmul %4, %5, %cst {dimension_numbers = #tpu.dot_dimension_numbers<[1], [0], [0], [1], [0, 0, 1, 1], [], []>} : vector<24x512xbf16>, vector<512x128xbf16>, vector<24x128xf32> -> vector<24x128xf32>
    %7 = arith.addf %3, %6 : vector<24x128xf32>
    %c0_6 = arith.constant 0 : index
    %c0_7 = arith.constant 0 : index
    %8 = vector.load %arg7[%c0_6, %c0_7] : memref<24x128xf32, #tpu.memory_space<vmem>>, vector<24x128xf32>
    tpu.vector_store %arg7[%c0_6, %c0_7], %7 {strides = array<i32>} : memref<24x128xf32, #tpu.memory_space<vmem>>, vector<24x128xf32>,
    %c0_i32_8 = arith.constant 0 : i32
    %9 = arith.cmpi eq, %arg2, %c0_i32_8 : i32
    %10 = arith.extui %9 : i1 to i32
    %c0_i32_9 = arith.constant 0 : i32
    %11 = arith.cmpi ne, %10, %c0_i32_9 : i32
    scf.if %11 {
      %c0_10 = arith.constant 0 : index
      %c0_11 = arith.constant 0 : index
      %12 = vector.load %arg7[%c0_10, %c0_11] : memref<24x128xf32, #tpu.memory_space<vmem>>, vector<24x128xf32>
      %cst_12 = arith.constant 0.000000e+00 : f32
      %13 = vector.broadcast %cst_12 : f32 to vector<24x128xf32>
      %14 = arith.maximumf %12, %13 : vector<24x128xf32>
      %15 = arith.truncf %14 : vector<24x128xf32> to vector<24x128xbf16>
      %c0_13 = arith.constant 0 : index
      %c0_14 = arith.constant 0 : index
      %16 = vector.load %arg6[%c0_13, %c0_14] : memref<24x128xbf16, #tpu.memory_space<vmem>>, vector<24x128xbf16>
      tpu.vector_store %arg6[%c0_13, %c0_14], %15 {strides = array<i32>} : memref<24x128xbf16, #tpu.memory_space<vmem>>, vector<24x128xbf16>,
    } else {
    }
    return
  }
  func.func @transform_0(%arg0: i32, %arg1: i32, %arg2: i32) -> (i32, i32) {
    %c0_i32 = arith.constant 0 : i32
    return %arg0, %arg2 : i32, i32
  }
  func.func @transform_1(%arg0: i32, %arg1: i32, %arg2: i32) -> (i32, i32) {
    %c0_i32 = arith.constant 0 : i32
    return %arg2, %arg1 : i32, i32
  }
  func.func @transform_2(%arg0: i32, %arg1: i32, %arg2: i32) -> (i32, i32) {
    %c0_i32 = arith.constant 0 : i32
    %c0_i32_0 = arith.constant 0 : i32
    return %c0_i32, %arg1 : i32, i32
  }
  func.func @transform_3(%arg0: i32, %arg1: i32, %arg2: i32) -> (i32, i32) {
    %c0_i32 = arith.constant 0 : i32
    return %arg0, %arg1 : i32, i32
  }
}

module attributes {stable_mosaic.version = 11 : i64} {
  func.func @_fused_matmul_kernel(%arg0: i32, %arg1: i32, %arg2: i32, %arg3: memref<8x128xbf16, #tpu.memory_space<vmem>>, %arg4: memref<128x128xbf16, #tpu.memory_space<vmem>>, %arg5: memref<1x128xf32, #tpu.memory_space<vmem>>, %arg6: memref<8x128xbf16, #tpu.memory_space<vmem>>, %arg7: memref<8x128xf32, #tpu.memory_space<vmem>>) attributes {dimension_semantics = [#tpu.dimension_semantics<parallel>, #tpu.dimension_semantics<parallel>, #tpu.dimension_semantics<arbitrary>], iteration_bounds = array<i64: 1, 1, 5>, scalar_prefetch = 0 : i64, scratch_operands = 1 : i64, tpu.core_type = #tpu.core_type<tc>, window_params = [{transform_indices = @transform_0, window_bounds = array<i64: 8, 128>}, {transform_indices = @transform_1, window_bounds = array<i64: 128, 128>}, {transform_indices = @transform_2, window_bounds = array<i64: 1, 128>}, {transform_indices = @transform_3, window_bounds = array<i64: 8, 128>}]} {
    %c0_i32 = arith.constant 0 : i32
    %0 = arith.cmpi eq, %arg2, %c0_i32 : i32
    %1 = arith.extui %0 : i1 to i32
    %c0_i32_0 = arith.constant 0 : i32
    %2 = arith.cmpi ne, %1, %c0_i32_0 : i32
    scf.if %2 {
      %c0_9 = arith.constant 0 : index
      %c0_10 = arith.constant 0 : index
      %12 = vector.load %arg5[%c0_9, %c0_10] : memref<1x128xf32, #tpu.memory_space<vmem>>, vector<1x128xf32>
      %13 = vector.shape_cast %12 : vector<1x128xf32> to vector<1x128xf32>
      %14 = vector.broadcast %13 : vector<1x128xf32> to vector<8x128xf32>
      %c0_11 = arith.constant 0 : index
      %c0_12 = arith.constant 0 : index
      %15 = vector.load %arg7[%c0_11, %c0_12] : memref<8x128xf32, #tpu.memory_space<vmem>>, vector<8x128xf32>
      tpu.vector_store %arg7[%c0_11, %c0_12], %14 {strides = array<i32>} : memref<8x128xf32, #tpu.memory_space<vmem>>, vector<8x128xf32>,
    } else {
    }
    %c0 = arith.constant 0 : index
    %c0_1 = arith.constant 0 : index
    %3 = vector.load %arg7[%c0, %c0_1] : memref<8x128xf32, #tpu.memory_space<vmem>>, vector<8x128xf32>
    %c0_2 = arith.constant 0 : index
    %c0_3 = arith.constant 0 : index
    %4 = vector.load %arg3[%c0_2, %c0_3] : memref<8x128xbf16, #tpu.memory_space<vmem>>, vector<8x128xbf16>
    %c0_4 = arith.constant 0 : index
    %c0_5 = arith.constant 0 : index
    %5 = vector.load %arg4[%c0_4, %c0_5] : memref<128x128xbf16, #tpu.memory_space<vmem>>, vector<128x128xbf16>
    %cst = arith.constant dense<0.000000e+00> : vector<8x128xf32>
    %6 = tpu.matmul %4, %5, %cst {dimension_numbers = #tpu.dot_dimension_numbers<[1], [0], [0], [1], [0, 0, 1, 1], [], []>} : vector<8x128xbf16>, vector<128x128xbf16>, vector<8x128xf32> -> vector<8x128xf32>
    %7 = arith.addf %3, %6 : vector<8x128xf32>
    %c0_6 = arith.constant 0 : index
    %c0_7 = arith.constant 0 : index
    %8 = vector.load %arg7[%c0_6, %c0_7] : memref<8x128xf32, #tpu.memory_space<vmem>>, vector<8x128xf32>
    tpu.vector_store %arg7[%c0_6, %c0_7], %7 {strides = array<i32>} : memref<8x128xf32, #tpu.memory_space<vmem>>, vector<8x128xf32>,
    %c4_i32 = arith.constant 4 : i32
    %9 = arith.cmpi eq, %arg2, %c4_i32 : i32
    %10 = arith.extui %9 : i1 to i32
    %c0_i32_8 = arith.constant 0 : i32
    %11 = arith.cmpi ne, %10, %c0_i32_8 : i32
    scf.if %11 {
      %c0_9 = arith.constant 0 : index
      %c0_10 = arith.constant 0 : index
      %12 = vector.load %arg7[%c0_9, %c0_10] : memref<8x128xf32, #tpu.memory_space<vmem>>, vector<8x128xf32>
      %cst_11 = arith.constant 0.000000e+00 : f32
      %13 = vector.broadcast %cst_11 : f32 to vector<8x128xf32>
      %14 = arith.maximumf %12, %13 : vector<8x128xf32>
      %15 = arith.truncf %14 : vector<8x128xf32> to vector<8x128xbf16>
      %c0_12 = arith.constant 0 : index
      %c0_13 = arith.constant 0 : index
      %16 = vector.load %arg6[%c0_12, %c0_13] : memref<8x128xbf16, #tpu.memory_space<vmem>>, vector<8x128xbf16>
      tpu.vector_store %arg6[%c0_12, %c0_13], %15 {strides = array<i32>} : memref<8x128xbf16, #tpu.memory_space<vmem>>, vector<8x128xbf16>,
    } else {
    }
    return
  }
  func.func @transform_0(%arg0: i32, %arg1: i32, %arg2: i32) -> (i32, i32) {
    %c0_i32 = arith.constant 0 : i32
    return %arg0, %arg2 : i32, i32
  }
  func.func @transform_1(%arg0: i32, %arg1: i32, %arg2: i32) -> (i32, i32) {
    %c0_i32 = arith.constant 0 : i32
    return %arg2, %arg1 : i32, i32
  }
  func.func @transform_2(%arg0: i32, %arg1: i32, %arg2: i32) -> (i32, i32) {
    %c0_i32 = arith.constant 0 : i32
    %c0_i32_0 = arith.constant 0 : i32
    return %c0_i32, %arg1 : i32, i32
  }
  func.func @transform_3(%arg0: i32, %arg1: i32, %arg2: i32) -> (i32, i32) {
    %c0_i32 = arith.constant 0 : i32
    return %arg0, %arg1 : i32, i32
  }
}

module attributes {stable_mosaic.version = 11 : i64} {
  func.func @_fused_matmul_kernel(%arg0: i32, %arg1: i32, %arg2: i32, %arg3: memref<8x128xbf16, #tpu.memory_space<vmem>>, %arg4: memref<128x256xbf16, #tpu.memory_space<vmem>>, %arg5: memref<1x256xf32, #tpu.memory_space<vmem>>, %arg6: memref<8x256xbf16, #tpu.memory_space<vmem>>, %arg7: memref<8x256xf32, #tpu.memory_space<vmem>>) attributes {dimension_semantics = [#tpu.dimension_semantics<parallel>, #tpu.dimension_semantics<parallel>, #tpu.dimension_semantics<arbitrary>], iteration_bounds = array<i64: 1, 2, 1>, scalar_prefetch = 0 : i64, scratch_operands = 1 : i64, tpu.core_type = #tpu.core_type<tc>, window_params = [{transform_indices = @transform_0, window_bounds = array<i64: 8, 128>}, {transform_indices = @transform_1, window_bounds = array<i64: 128, 256>}, {transform_indices = @transform_2, window_bounds = array<i64: 1, 256>}, {transform_indices = @transform_3, window_bounds = array<i64: 8, 256>}]} {
    %c0_i32 = arith.constant 0 : i32
    %0 = arith.cmpi eq, %arg2, %c0_i32 : i32
    %1 = arith.extui %0 : i1 to i32
    %c0_i32_0 = arith.constant 0 : i32
    %2 = arith.cmpi ne, %1, %c0_i32_0 : i32
    scf.if %2 {
      %c0_10 = arith.constant 0 : index
      %c0_11 = arith.constant 0 : index
      %12 = vector.load %arg5[%c0_10, %c0_11] : memref<1x256xf32, #tpu.memory_space<vmem>>, vector<1x256xf32>
      %13 = vector.shape_cast %12 : vector<1x256xf32> to vector<1x256xf32>
      %14 = vector.broadcast %13 : vector<1x256xf32> to vector<8x256xf32>
      %c0_12 = arith.constant 0 : index
      %c0_13 = arith.constant 0 : index
      %15 = vector.load %arg7[%c0_12, %c0_13] : memref<8x256xf32, #tpu.memory_space<vmem>>, vector<8x256xf32>
      tpu.vector_store %arg7[%c0_12, %c0_13], %14 {strides = array<i32>} : memref<8x256xf32, #tpu.memory_space<vmem>>, vector<8x256xf32>,
    } else {
    }
    %c0 = arith.constant 0 : index
    %c0_1 = arith.constant 0 : index
    %3 = vector.load %arg7[%c0, %c0_1] : memref<8x256xf32, #tpu.memory_space<vmem>>, vector<8x256xf32>
    %c0_2 = arith.constant 0 : index
    %c0_3 = arith.constant 0 : index
    %4 = vector.load %arg3[%c0_2, %c0_3] : memref<8x128xbf16, #tpu.memory_space<vmem>>, vector<8x128xbf16>
    %c0_4 = arith.constant 0 : index
    %c0_5 = arith.constant 0 : index
    %5 = vector.load %arg4[%c0_4, %c0_5] : memref<128x256xbf16, #tpu.memory_space<vmem>>, vector<128x256xbf16>
    %cst = arith.constant dense<0.000000e+00> : vector<8x256xf32>
    %6 = tpu.matmul %4, %5, %cst {dimension_numbers = #tpu.dot_dimension_numbers<[1], [0], [0], [1], [0, 0, 1, 1], [], []>} : vector<8x128xbf16>, vector<128x256xbf16>, vector<8x256xf32> -> vector<8x256xf32>
    %7 = arith.addf %3, %6 : vector<8x256xf32>
    %c0_6 = arith.constant 0 : index
    %c0_7 = arith.constant 0 : index
    %8 = vector.load %arg7[%c0_6, %c0_7] : memref<8x256xf32, #tpu.memory_space<vmem>>, vector<8x256xf32>
    tpu.vector_store %arg7[%c0_6, %c0_7], %7 {strides = array<i32>} : memref<8x256xf32, #tpu.memory_space<vmem>>, vector<8x256xf32>,
    %c0_i32_8 = arith.constant 0 : i32
    %9 = arith.cmpi eq, %arg2, %c0_i32_8 : i32
    %10 = arith.extui %9 : i1 to i32
    %c0_i32_9 = arith.constant 0 : i32
    %11 = arith.cmpi ne, %10, %c0_i32_9 : i32
    scf.if %11 {
      %c0_10 = arith.constant 0 : index
      %c0_11 = arith.constant 0 : index
      %12 = vector.load %arg7[%c0_10, %c0_11] : memref<8x256xf32, #tpu.memory_space<vmem>>, vector<8x256xf32>
      %cst_12 = arith.constant 0.000000e+00 : f32
      %13 = vector.broadcast %cst_12 : f32 to vector<8x256xf32>
      %14 = arith.maximumf %12, %13 : vector<8x256xf32>
      %15 = arith.truncf %14 : vector<8x256xf32> to vector<8x256xbf16>
      %c0_13 = arith.constant 0 : index
      %c0_14 = arith.constant 0 : index
      %16 = vector.load %arg6[%c0_13, %c0_14] : memref<8x256xbf16, #tpu.memory_space<vmem>>, vector<8x256xbf16>
      tpu.vector_store %arg6[%c0_13, %c0_14], %15 {strides = array<i32>} : memref<8x256xbf16, #tpu.memory_space<vmem>>, vector<8x256xbf16>,
    } else {
    }
    return
  }
  func.func @transform_0(%arg0: i32, %arg1: i32, %arg2: i32) -> (i32, i32) {
    %c0_i32 = arith.constant 0 : i32
    return %arg0, %arg2 : i32, i32
  }
  func.func @transform_1(%arg0: i32, %arg1: i32, %arg2: i32) -> (i32, i32) {
    %c0_i32 = arith.constant 0 : i32
    return %arg2, %arg1 : i32, i32
  }
  func.func @transform_2(%arg0: i32, %arg1: i32, %arg2: i32) -> (i32, i32) {
    %c0_i32 = arith.constant 0 : i32
    %c0_i32_0 = arith.constant 0 : i32
    return %c0_i32, %arg1 : i32, i32
  }
  func.func @transform_3(%arg0: i32, %arg1: i32, %arg2: i32) -> (i32, i32) {
    %c0_i32 = arith.constant 0 : i32
    return %arg0, %arg1 : i32, i32
  }
}

module attributes {stable_mosaic.version = 11 : i64} {
  func.func @_fused_matmul_kernel(%arg0: i32, %arg1: i32, %arg2: i32, %arg3: memref<8x512xbf16, #tpu.memory_space<vmem>>, %arg4: memref<512x128xbf16, #tpu.memory_space<vmem>>, %arg5: memref<1x128xf32, #tpu.memory_space<vmem>>, %arg6: memref<8x128xf32, #tpu.memory_space<vmem>>, %arg7: memref<8x128xf32, #tpu.memory_space<vmem>>) attributes {dimension_semantics = [#tpu.dimension_semantics<parallel>, #tpu.dimension_semantics<parallel>, #tpu.dimension_semantics<arbitrary>], iteration_bounds = array<i64: 1, 1, 1>, scalar_prefetch = 0 : i64, scratch_operands = 1 : i64, tpu.core_type = #tpu.core_type<tc>, window_params = [{transform_indices = @transform_0, window_bounds = array<i64: 8, 512>}, {transform_indices = @transform_1, window_bounds = array<i64: 512, 128>}, {transform_indices = @transform_2, window_bounds = array<i64: 1, 128>}, {transform_indices = @transform_3, window_bounds = array<i64: 8, 128>}]} {
    %c0_i32 = arith.constant 0 : i32
    %0 = arith.cmpi eq, %arg2, %c0_i32 : i32
    %1 = arith.extui %0 : i1 to i32
    %c0_i32_0 = arith.constant 0 : i32
    %2 = arith.cmpi ne, %1, %c0_i32_0 : i32
    scf.if %2 {
      %c0_10 = arith.constant 0 : index
      %c0_11 = arith.constant 0 : index
      %12 = vector.load %arg5[%c0_10, %c0_11] : memref<1x128xf32, #tpu.memory_space<vmem>>, vector<1x128xf32>
      %13 = vector.shape_cast %12 : vector<1x128xf32> to vector<1x128xf32>
      %14 = vector.broadcast %13 : vector<1x128xf32> to vector<8x128xf32>
      %c0_12 = arith.constant 0 : index
      %c0_13 = arith.constant 0 : index
      %15 = vector.load %arg7[%c0_12, %c0_13] : memref<8x128xf32, #tpu.memory_space<vmem>>, vector<8x128xf32>
      tpu.vector_store %arg7[%c0_12, %c0_13], %14 {strides = array<i32>} : memref<8x128xf32, #tpu.memory_space<vmem>>, vector<8x128xf32>,
    } else {
    }
    %c0 = arith.constant 0 : index
    %c0_1 = arith.constant 0 : index
    %3 = vector.load %arg7[%c0, %c0_1] : memref<8x128xf32, #tpu.memory_space<vmem>>, vector<8x128xf32>
    %c0_2 = arith.constant 0 : index
    %c0_3 = arith.constant 0 : index
    %4 = vector.load %arg3[%c0_2, %c0_3] : memref<8x512xbf16, #tpu.memory_space<vmem>>, vector<8x512xbf16>
    %c0_4 = arith.constant 0 : index
    %c0_5 = arith.constant 0 : index
    %5 = vector.load %arg4[%c0_4, %c0_5] : memref<512x128xbf16, #tpu.memory_space<vmem>>, vector<512x128xbf16>
    %cst = arith.constant dense<0.000000e+00> : vector<8x128xf32>
    %6 = tpu.matmul %4, %5, %cst {dimension_numbers = #tpu.dot_dimension_numbers<[1], [0], [0], [1], [0, 0, 1, 1], [], []>} : vector<8x512xbf16>, vector<512x128xbf16>, vector<8x128xf32> -> vector<8x128xf32>
    %7 = arith.addf %3, %6 : vector<8x128xf32>
    %c0_6 = arith.constant 0 : index
    %c0_7 = arith.constant 0 : index
    %8 = vector.load %arg7[%c0_6, %c0_7] : memref<8x128xf32, #tpu.memory_space<vmem>>, vector<8x128xf32>
    tpu.vector_store %arg7[%c0_6, %c0_7], %7 {strides = array<i32>} : memref<8x128xf32, #tpu.memory_space<vmem>>, vector<8x128xf32>,
    %c0_i32_8 = arith.constant 0 : i32
    %9 = arith.cmpi eq, %arg2, %c0_i32_8 : i32
    %10 = arith.extui %9 : i1 to i32
    %c0_i32_9 = arith.constant 0 : i32
    %11 = arith.cmpi ne, %10, %c0_i32_9 : i32
    scf.if %11 {
      %c0_10 = arith.constant 0 : index
      %c0_11 = arith.constant 0 : index
      %12 = vector.load %arg7[%c0_10, %c0_11] : memref<8x128xf32, #tpu.memory_space<vmem>>, vector<8x128xf32>
      %c0_12 = arith.constant 0 : index
      %c0_13 = arith.constant 0 : index
      %13 = vector.load %arg6[%c0_12, %c0_13] : memref<8x128xf32, #tpu.memory_space<vmem>>, vector<8x128xf32>
      tpu.vector_store %arg6[%c0_12, %c0_13], %12 {strides = array<i32>} : memref<8x128xf32, #tpu.memory_space<vmem>>, vector<8x128xf32>,
    } else {
    }
    return
  }
  func.func @transform_0(%arg0: i32, %arg1: i32, %arg2: i32) -> (i32, i32) {
    %c0_i32 = arith.constant 0 : i32
    return %arg0, %arg2 : i32, i32
  }
  func.func @transform_1(%arg0: i32, %arg1: i32, %arg2: i32) -> (i32, i32) {
    %c0_i32 = arith.constant 0 : i32
    return %arg2, %arg1 : i32, i32
  }
  func.func @transform_2(%arg0: i32, %arg1: i32, %arg2: i32) -> (i32, i32) {
    %c0_i32 = arith.constant 0 : i32
    %c0_i32_0 = arith.constant 0 : i32
    return %c0_i32, %arg1 : i32, i32
  }
  func.func @transform_3(%arg0: i32, %arg1: i32, %arg2: i32) -> (i32, i32) {
    %c0_i32 = arith.constant 0 : i32
    return %arg0, %arg1 : i32, i32
  }
}

</mosaic_0001>

<bundles_post_ra>
// kernel: atari_dqn_forward.5
= control target key start
LH: loop header
LB: loop body
LE: loop exit
PB: predicated region body
PF: predicated region fallthrough
CT: control target
= control target key end

     0   :  { %s912_s1 = inlined_call_operand.vmem [shape: bf16[256,128], index: 1, kind: input, shape index: {}]   ;;  %s913_s0 = inlined_call_operand.vmem [shape: bf16[128,256], index: 0, kind: input, shape index: {}]   ;;  %s914_s2 = inlined_call_operand.vmem [shape: f32[1,128], index: 2, kind: input, shape index: {}]   ;;  %s915_s3 = inlined_call_operand.vmem [shape: bf16[128,128], index: 3, kind: output, shape index: {}]  }
   0x1   :  { %v630_v0 = vld [vmem:[%s912_s1 + $0x38] sm:$0xff]  ;;  %v629_v2 = vld [vmem:[%s912_s1 + $0x30] sm:$0xff]  ;;  %v628_v4 = vld [vmem:[%s912_s1 + $0x28] sm:$0xff] }
   0x2   :  { %v638_v1 = vld [vmem:[%s912_s1 + $0x78] sm:$0xff]  ;;  %278 = vmatpush.bf16.msra.mxu0 %v630_v0  ;;  %686 = vmatpush.bf16.msra.mxu2 %v630_v0  ;;  %v637_v3 = vld [vmem:[%s912_s1 + $0x70] sm:$0xff]  ;;  %v636_v5 = vld [vmem:[%s912_s1 + $0x68] sm:$0xff] }
   0x3   :  { %327 = vmatpush.bf16.msra.mxu1 %v638_v1  ;;  %694 = vmatpush.bf16.msra.mxu3 %v638_v1  ;;  %v627_v6 = vld [vmem:[%s912_s1 + $0x20] sm:$0xff]  ;;  %v626_v8 = vld [vmem:[%s912_s1 + $0x18] sm:$0xff]  ;;  %v625_v10 = vld [vmem:[%s912_s1 + $0x10] sm:$0xff] }
   0x4   :  { %v635_v7 = vld [vmem:[%s912_s1 + $0x60] sm:$0xff]  ;;  %v634_v9 = vld [vmem:[%s912_s1 + $0x58] sm:$0xff]  ;;  %v633_v11 = vld [vmem:[%s912_s1 + $0x50] sm:$0xff] }
   0x5   :  { %v624_v12 = vld [vmem:[%s912_s1 + $0x8] sm:$0xff]  ;;  %v623_v14 = vld [vmem:[%s912_s1] sm:$0xff]  ;;  %v489_v28 = vld [vmem:[%s913_s0 + $0x10] sm:$0xf] }
   0x6   :  { %279 = vmatpush.bf16.msra.mxu0 %v629_v2  ;;  %687 = vmatpush.bf16.msra.mxu2 %v629_v2  ;;  %v632_v13 = vld [vmem:[%s912_s1 + $0x48] sm:$0xff]  ;;  %v631_v15 = vld [vmem:[%s912_s1 + $0x40] sm:$0xff]  ;;  %v610_v29 = vld [vmem:[%s913_s0 + $0x14] sm:$0xf0] }
   0x7   :  { %328 = vmatpush.bf16.msra.mxu1 %v637_v3  ;;  %695 = vmatpush.bf16.msra.mxu3 %v637_v3  ;;  %v481_v16 = vld [vmem:[%s913_s0] sm:$0xf]  ;;  %v608_v17 = vld [vmem:[%s913_s0 + $0x4] sm:$0xf0]  ;;  %v607_v20 = vld [vmem:[%s913_s0 + $0x4] sm:$0xf]  ;;  %v490_v36 = vor.u32 %v610_v29, %v489_v28 }
   0x8   :  { %v513_v18 = vld [vmem:[%s913_s0 + $0x40] sm:$0xf]  ;;  %v616_v19 = vld [vmem:[%s913_s0 + $0x44] sm:$0xf0]  ;;  %v483_v21 = vld [vmem:[%s913_s0 + $0x8] sm:$0xf0]  ;;  %v482_v24 = vor.u32 %v608_v17, %v481_v16 }
   0x9   :  { %v615_v22 = vld [vmem:[%s913_s0 + $0x44] sm:$0xf]  ;;  %v515_v23 = vld [vmem:[%s913_s0 + $0x48] sm:$0xf0]  ;;  %v514_v25 = vor.u32 %v616_v19, %v513_v18  ;;  %v486_v26 = vor.u32 %v607_v20, %v483_v21  ;;  %v521_v30 = vld [vmem:[%s913_s0 + $0x50] sm:$0xf] }
   0xa   :  { %280 = vmatpush.bf16.msra.mxu0 %v628_v4  ;;  %688 = vmatpush.bf16.msra.mxu2 %v628_v4  ;;  %v518_v27 = vor.u32 %v615_v22, %v515_v23  ;;  %v618_v31 = vld [vmem:[%s913_s0 + $0x54] sm:$0xf0]  ;;  %v609_v32 = vld [vmem:[%s913_s0 + $0x14] sm:$0xf]  ;;  %v491_v33 = vld [vmem:[%s913_s0 + $0x18] sm:$0xf0] }
   0xb   :  { %329 = vmatpush.bf16.msra.mxu1 %v636_v5  ;;  %696 = vmatpush.bf16.msra.mxu3 %v636_v5  ;;  %v617_v34 = vld [vmem:[%s913_s0 + $0x54] sm:$0xf]  ;;  %v523_v35 = vld [vmem:[%s913_s0 + $0x58] sm:$0xf0]  ;;  %v522_v37 = vor.u32 %v618_v31, %v521_v30  ;;  %v494_v38 = vor.u32 %v609_v32, %v491_v33  ;;  %v497_v40 = vld [vmem:[%s913_s0 + $0x20] sm:$0xf] }
   0xc   :  { %v526_v39 = vor.u32 %v617_v34, %v523_v35  ;;  %v612_v41 = vld [vmem:[%s913_s0 + $0x24] sm:$0xf0]  ;;  %v529_v42 = vld [vmem:[%s913_s0 + $0x60] sm:$0xf]  ;;  %v611_v44 = vld [vmem:[%s913_s0 + $0x24] sm:$0xf] }
   0xd   :  { %v620_v43 = vld [vmem:[%s913_s0 + $0x64] sm:$0xf0]  ;;  %v499_v45 = vld [vmem:[%s913_s0 + $0x28] sm:$0xf0]  ;;  %v619_v46 = vld [vmem:[%s913_s0 + $0x64] sm:$0xf]  ;;  %v498_v48 = vor.u32 %v612_v41, %v497_v40 }
   0xe   :  { %281 = vmatpush.bf16.msra.mxu0 %v627_v6  ;;  %689 = vmatpush.bf16.msra.mxu2 %v627_v6  ;;  %v531_v47 = vld [vmem:[%s913_s0 + $0x68] sm:$0xf0]  ;;  %v530_v49 = vor.u32 %v620_v43, %v529_v42  ;;  %v502_v50 = vor.u32 %v611_v44, %v499_v45  ;;  %v505_v52 = vld [vmem:[%s913_s0 + $0x30] sm:$0xf]  ;;  %v614_v53 = vld [vmem:[%s913_s0 + $0x34] sm:$0xf0] }
   0xf   :  { %330 = vmatpush.bf16.msra.mxu1 %v635_v7  ;;  %697 = vmatpush.bf16.msra.mxu3 %v635_v7  ;;  %v534_v51 = vor.u32 %v619_v46, %v531_v47  ;;  %v537_v54 = vld [vmem:[%s913_s0 + $0x70] sm:$0xf]  ;;  %v622_v55 = vld [vmem:[%s913_s0 + $0x74] sm:$0xf0]  ;;  %v613_v56 = vld [vmem:[%s913_s0 + $0x34] sm:$0xf]  ;;  %v506_v60 = vor.u32 %v614_v53, %v505_v52 }
  0x10   :  { %v507_v57 = vld [vmem:[%s913_s0 + $0x38] sm:$0xf0]  ;;  %v621_v58 = vld [vmem:[%s913_s0 + $0x74] sm:$0xf]  ;;  %v538_v61 = vor.u32 %v622_v55, %v537_v54  ;;  %v870_v2 = vld [vmem:[%s914_s2] ss:$0 sm:$0xff] }
  0x11   :  { %v539_v59 = vld [vmem:[%s913_s0 + $0x78] sm:$0xf0]  ;;  %v510_v62 = vor.u32 %v613_v56, %v507_v57 }
  0x12   :  { %282 = vmatpush.bf16.msra.mxu0 %v626_v8  ;;  %690 = vmatpush.bf16.msra.mxu2 %v626_v8  ;;  %v542_v63 = vor.u32 %v621_v58, %v539_v59 }
  0x13   :  { %331 = vmatpush.bf16.msra.mxu1 %v634_v9  ;;  %698 = vmatpush.bf16.msra.mxu3 %v634_v9 }
  0x16   :  { %283 = vmatpush.bf16.msra.mxu0 %v625_v10  ;;  %691 = vmatpush.bf16.msra.mxu2 %v625_v10 }
  0x17   :  { %332 = vmatpush.bf16.msra.mxu1 %v633_v11  ;;  %699 = vmatpush.bf16.msra.mxu3 %v633_v11 }
  0x1a   :  { %284 = vmatpush.bf16.msra.mxu0 %v624_v12  ;;  %692 = vmatpush.bf16.msra.mxu2 %v624_v12 }
  0x1b   :  { %333 = vmatpush.bf16.msra.mxu1 %v632_v13  ;;  %700 = vmatpush.bf16.msra.mxu3 %v632_v13 }
  0x1e   :  { %285 = vmatpush.bf16.msra.mxu0 %v623_v14  ;;  %693 = vmatpush.bf16.msra.mxu2 %v623_v14 }
  0x1f   :  { %334 = vmatpush.bf16.msra.mxu1 %v631_v15  ;;  %701 = vmatpush.bf16.msra.mxu3 %v631_v15 }
  0x21   :  { %286 = vmatmul.bf16.vlgmr.msra.gmra.mxu0 %v482_v24  ;;  %306 = vmatmul.bf16.vlgmr.msra.gmra.mxu2 %v514_v25 }
  0x22   :  { %335 = vmatmul.bf16.vlgmr.msra.gmra.mxu1 %v486_v26  ;;  %355 = vmatmul.bf16.vlgmr.msra.gmra.mxu3 %v518_v27 }
  0x31   :  { %291 = vmatmul.bf16.gmra.mxu0 %v490_v36  ;;  %311 = vmatmul.bf16.gmra.mxu2 %v522_v37 }
  0x32   :  { %340 = vmatmul.bf16.gmra.mxu1 %v494_v38  ;;  %360 = vmatmul.bf16.gmra.mxu3 %v526_v39 }
  0x41   :  { %296 = vmatmul.bf16.gmra.mxu0 %v498_v48  ;;  %316 = vmatmul.bf16.gmra.mxu2 %v530_v49 }
  0x42   :  { %345 = vmatmul.bf16.gmra.mxu1 %v502_v50  ;;  %365 = vmatmul.bf16.gmra.mxu3 %v534_v51 }
  0x51   :  { %301 = vmatmul.bf16.gmra.mxu0 %v506_v60  ;;  %321 = vmatmul.bf16.gmra.mxu2 %v538_v61 }
  0x52   :  { %350 = vmatmul.bf16.gmra.mxu1 %v510_v62  ;;  %370 = vmatmul.bf16.gmra.mxu3 %v542_v63 }
  0x9e   :  { %v287_v0 = vpop.f32.mrf.mxu0 }
  0x9f   :  { %v336_v1 = vpop.f32.mrf.mxu1 }
  0xa0   :  { %v337_v3 = vadd.f32 %v336_v1, %v287_v0 }
  0xa2   :  { %v376_v8 = vadd.f32 %v870_v2, %v337_v3 }
  0xa4   :  { %v307_v4 = vpop.f32.mrf.mxu2  ;;  %v427_v12 = vmax.f32 %v376_v8, 0.0 }
  0xa5   :  { %v356_v5 = vpop.f32.mrf.mxu3 }
  0xa6   :  { %v289_v6 = vpop.f32.mrf.mxu0  ;;  %v357_v10 = vadd.f32 %v356_v5, %v307_v4 }
  0xa7   :  { %v338_v7 = vpop.f32.mrf.mxu1 }
  0xa8   :  { %v339_v9 = vadd.f32 %v338_v7, %v289_v6  ;;  %v384_v16 = vadd.f32 %v870_v2, %v357_v10 }
  0xaa   :  { %v377_v11 = vadd.f32 %v870_v2, %v339_v9  ;;  %v435_v22 = vmax.f32 %v384_v16, 0.0 }
  0xac   :  { %v428_v13 = vmax.f32 %v377_v11, 0.0  ;;  %v309_v14 = vpop.f32.mrf.mxu2 }
  0xad   :  { %v358_v15 = vpop.f32.mrf.mxu3 }
  0xae   :  { %v642_v17 = vpack.c.bf16 %v428_v13, %v427_v12  ;;  %v359_v18 = vadd.f32 %v358_v15, %v309_v14  ;;  %v292_v19 = vpop.f32.mrf.mxu0 }
  0xaf   :  { %v341_v20 = vpop.f32.mrf.mxu1 }
  0xb0   :  { %643 = vst [vmem:[%s915_s3] sm:$0xff] %v642_v17   ;;  %v385_v21 = vadd.f32 %v870_v2, %v359_v18  ;;  %v342_v25 = vadd.f32 %v341_v20, %v292_v19 }
  0xb2   :  { %v436_v23 = vmax.f32 %v385_v21, 0.0  ;;  %v378_v30 = vadd.f32 %v870_v2, %v342_v25 }
  0xb4   :  { %v662_v24 = vpack.c.bf16 %v436_v23, %v435_v22  ;;  %v312_v26 = vpop.f32.mrf.mxu2  ;;  %v429_v34 = vmax.f32 %v378_v30, 0.0 }
  0xb5   :  { %v361_v27 = vpop.f32.mrf.mxu3 }
  0xb6   :  { %682 = vst [vmem:[%s915_s3 + $0x20] sm:$0xff] %v662_v24   ;;  %v294_v28 = vpop.f32.mrf.mxu0  ;;  %v362_v32 = vadd.f32 %v361_v27, %v312_v26 }
  0xb7   :  { %v343_v29 = vpop.f32.mrf.mxu1 }
  0xb8   :  { %v344_v31 = vadd.f32 %v343_v29, %v294_v28  ;;  %v386_v38 = vadd.f32 %v870_v2, %v362_v32 }
  0xba   :  { %v379_v33 = vadd.f32 %v870_v2, %v344_v31  ;;  %v437_v44 = vmax.f32 %v386_v38, 0.0 }
  0xbc   :  { %v430_v35 = vmax.f32 %v379_v33, 0.0  ;;  %v314_v36 = vpop.f32.mrf.mxu2 }
  0xbd   :  { %v363_v37 = vpop.f32.mrf.mxu3 }
  0xbe   :  { %v647_v39 = vpack.c.bf16 %v430_v35, %v429_v34  ;;  %v364_v40 = vadd.f32 %v363_v37, %v314_v36  ;;  %v297_v41 = vpop.f32.mrf.mxu0 }
  0xbf   :  { %v346_v42 = vpop.f32.mrf.mxu1 }
  0xc0   :  { %679 = vst [vmem:[%s915_s3 + $0x8] sm:$0xff] %v647_v39   ;;  %v387_v43 = vadd.f32 %v870_v2, %v364_v40  ;;  %v347_v47 = vadd.f32 %v346_v42, %v297_v41 }
  0xc2   :  { %v438_v45 = vmax.f32 %v387_v43, 0.0  ;;  %v380_v52 = vadd.f32 %v870_v2, %v347_v47 }
  0xc4   :  { %v667_v46 = vpack.c.bf16 %v438_v45, %v437_v44  ;;  %v317_v48 = vpop.f32.mrf.mxu2  ;;  %v431_v56 = vmax.f32 %v380_v52, 0.0 }
  0xc5   :  { %v366_v49 = vpop.f32.mrf.mxu3 }
  0xc6   :  { %683 = vst [vmem:[%s915_s3 + $0x28] sm:$0xff] %v667_v46   ;;  %v299_v50 = vpop.f32.mrf.mxu0  ;;  %v367_v54 = vadd.f32 %v366_v49, %v317_v48 }
  0xc7   :  { %v348_v51 = vpop.f32.mrf.mxu1 }
  0xc8   :  { %v349_v53 = vadd.f32 %v348_v51, %v299_v50  ;;  %v388_v60 = vadd.f32 %v870_v2, %v367_v54 }
  0xca   :  { %v381_v55 = vadd.f32 %v870_v2, %v349_v53  ;;  %v439_v3 = vmax.f32 %v388_v60, 0.0 }
  0xcc   :  { %v432_v57 = vmax.f32 %v381_v55, 0.0  ;;  %v319_v58 = vpop.f32.mrf.mxu2 }
  0xcd   :  { %v368_v59 = vpop.f32.mrf.mxu3 }
  0xce   :  { %v652_v61 = vpack.c.bf16 %v432_v57, %v431_v56  ;;  %v369_v62 = vadd.f32 %v368_v59, %v319_v58  ;;  %v302_v63 = vpop.f32.mrf.mxu0 }
  0xcf   :  { %v351_v0 = vpop.f32.mrf.mxu1 }
  0xd0   :  { %680 = vst [vmem:[%s915_s3 + $0x10] sm:$0xff] %v652_v61   ;;  %v389_v1 = vadd.f32 %v870_v2, %v369_v62  ;;  %v352_v6 = vadd.f32 %v351_v0, %v302_v63 }
  0xd2   :  { %v440_v4 = vmax.f32 %v389_v1, 0.0  ;;  %v382_v11 = vadd.f32 %v870_v2, %v352_v6 }
  0xd4   :  { %v672_v5 = vpack.c.bf16 %v440_v4, %v439_v3  ;;  %v322_v7 = vpop.f32.mrf.mxu2  ;;  %v433_v15 = vmax.f32 %v382_v11, 0.0 }
  0xd5   :  { %v371_v8 = vpop.f32.mrf.mxu3 }
  0xd6   :  { %684 = vst [vmem:[%s915_s3 + $0x30] sm:$0xff] %v672_v5   ;;  %v304_v9 = vpop.f32.mrf.mxu0  ;;  %v372_v13 = vadd.f32 %v371_v8, %v322_v7 }
  0xd7   :  { %v353_v10 = vpop.f32.mrf.mxu1 }
  0xd8   :  { %v354_v12 = vadd.f32 %v353_v10, %v304_v9  ;;  %v390_v19 = vadd.f32 %v870_v2, %v372_v13 }
  0xda   :  { %v383_v14 = vadd.f32 %v870_v2, %v354_v12  ;;  %v441_v23 = vmax.f32 %v390_v19, 0.0 }
  0xdc   :  { %v434_v16 = vmax.f32 %v383_v14, 0.0  ;;  %v324_v17 = vpop.f32.mrf.mxu2 }
  0xdd   :  { %v373_v18 = vpop.f32.mrf.mxu3 }
  0xde   :  { %v657_v20 = vpack.c.bf16 %v434_v16, %v433_v15  ;;  %v374_v21 = vadd.f32 %v373_v18, %v324_v17 }
  0xe0   :  { %681 = vst [vmem:[%s915_s3 + $0x18] sm:$0xff] %v657_v20   ;;  %v391_v22 = vadd.f32 %v870_v2, %v374_v21 }
  0xe2   :  { %v442_v24 = vmax.f32 %v391_v22, 0.0 }
  0xe4   :  { %v677_v25 = vpack.c.bf16 %v442_v24, %v441_v23 }
  0xe6   :  { %685 = vst [vmem:[%s915_s3 + $0x38] sm:$0xff] %v677_v25  }

// kernel: atari_dqn_forward.6
= control target key start
LH: loop header
LB: loop body
LE: loop exit
PB: predicated region body
PF: predicated region fallthrough
CT: control target
= control target key end

     0   :  { %s762_s1 = inlined_call_operand.vmem [shape: bf16[512,128], index: 1, kind: input, shape index: {}]   ;;  %s763_s0 = inlined_call_operand.vmem [shape: bf16[24,512], index: 0, kind: input, shape index: {}]   ;;  %s764_s2 = inlined_call_operand.vmem [shape: f32[1,128], index: 2, kind: input, shape index: {}]   ;;  %s765_s3 = inlined_call_operand.vmem [shape: bf16[24,128], index: 3, kind: output, shape index: {}]  }
   0x1   :  { %v576_v0 = vld [vmem:[%s762_s1 + $0x38] sm:$0xff]  ;;  %v575_v4 = vld [vmem:[%s762_s1 + $0x30] sm:$0xff]  ;;  %v574_v8 = vld [vmem:[%s762_s1 + $0x28] sm:$0xff] }
   0x2   :  { %v584_v1 = vld [vmem:[%s762_s1 + $0x78] sm:$0xff]  ;;  %324 = vmatpush.bf16.msra.mxu0 %v576_v0  ;;  %v583_v5 = vld [vmem:[%s762_s1 + $0x70] sm:$0xff]  ;;  %v582_v9 = vld [vmem:[%s762_s1 + $0x68] sm:$0xff] }
   0x3   :  { %v592_v2 = vld [vmem:[%s762_s1 + $0xb8] sm:$0xff]  ;;  %342 = vmatpush.bf16.msra.mxu1 %v584_v1  ;;  %v591_v6 = vld [vmem:[%s762_s1 + $0xb0] sm:$0xff]  ;;  %v590_v10 = vld [vmem:[%s762_s1 + $0xa8] sm:$0xff] }
   0x4   :  { %v600_v3 = vld [vmem:[%s762_s1 + $0xf8] sm:$0xff]  ;;  %360 = vmatpush.bf16.msra.mxu2 %v592_v2  ;;  %v599_v7 = vld [vmem:[%s762_s1 + $0xf0] sm:$0xff]  ;;  %v598_v11 = vld [vmem:[%s762_s1 + $0xe8] sm:$0xff] }
   0x5   :  { %378 = vmatpush.bf16.msra.mxu3 %v600_v3  ;;  %v573_v12 = vld [vmem:[%s762_s1 + $0x20] sm:$0xff]  ;;  %v572_v16 = vld [vmem:[%s762_s1 + $0x18] sm:$0xff]  ;;  %v571_v20 = vld [vmem:[%s762_s1 + $0x10] sm:$0xff] }
   0x6   :  { %325 = vmatpush.bf16.msra.mxu0 %v575_v4  ;;  %v581_v13 = vld [vmem:[%s762_s1 + $0x60] sm:$0xff]  ;;  %v580_v17 = vld [vmem:[%s762_s1 + $0x58] sm:$0xff]  ;;  %v579_v21 = vld [vmem:[%s762_s1 + $0x50] sm:$0xff] }
   0x7   :  { %343 = vmatpush.bf16.msra.mxu1 %v583_v5  ;;  %v589_v14 = vld [vmem:[%s762_s1 + $0xa0] sm:$0xff]  ;;  %v588_v18 = vld [vmem:[%s762_s1 + $0x98] sm:$0xff]  ;;  %v587_v22 = vld [vmem:[%s762_s1 + $0x90] sm:$0xff] }
   0x8   :  { %361 = vmatpush.bf16.msra.mxu2 %v591_v6  ;;  %v597_v15 = vld [vmem:[%s762_s1 + $0xe0] sm:$0xff]  ;;  %v596_v19 = vld [vmem:[%s762_s1 + $0xd8] sm:$0xff]  ;;  %v595_v23 = vld [vmem:[%s762_s1 + $0xd0] sm:$0xff] }
   0x9   :  { %379 = vmatpush.bf16.msra.mxu3 %v599_v7  ;;  %v570_v24 = vld [vmem:[%s762_s1 + $0x8] sm:$0xff]  ;;  %v569_v28 = vld [vmem:[%s762_s1] sm:$0xff]  ;;  %v567_v33 = vld [vmem:[%s763_s0 + $0xc] sm:$0xf0] }
   0xa   :  { %326 = vmatpush.bf16.msra.mxu0 %v574_v8  ;;  %v578_v25 = vld [vmem:[%s762_s1 + $0x48] sm:$0xff]  ;;  %v577_v29 = vld [vmem:[%s762_s1 + $0x40] sm:$0xff]  ;;  %v425_v35 = vld [vmem:[%s763_s0 + $0x10] sm:$0xf0] }
   0xb   :  { %344 = vmatpush.bf16.msra.mxu1 %v582_v9  ;;  %v586_v26 = vld [vmem:[%s762_s1 + $0x88] sm:$0xff]  ;;  %v585_v30 = vld [vmem:[%s762_s1 + $0x80] sm:$0xff]  ;;  %v568_v37 = vld [vmem:[%s763_s0 + $0x14] sm:$0xf0] }
   0xc   :  { %362 = vmatpush.bf16.msra.mxu2 %v590_v10  ;;  %v594_v27 = vld [vmem:[%s762_s1 + $0xc8] sm:$0xff]  ;;  %v593_v31 = vld [vmem:[%s762_s1 + $0xc0] sm:$0xff]  ;;  %v433_v39 = vld [vmem:[%s763_s0 + $0x18] sm:$0xf0] }
   0xd   :  { %380 = vmatpush.bf16.msra.mxu3 %v598_v11  ;;  %v423_v32 = vld [vmem:[%s763_s0] sm:$0xf]  ;;  %v565_v34 = vld [vmem:[%s763_s0 + $0x4] sm:$0xf]  ;;  %v431_v36 = vld [vmem:[%s763_s0 + $0x8] sm:$0xf] }
   0xe   :  { %327 = vmatpush.bf16.msra.mxu0 %v573_v12  ;;  %v566_v38 = vld [vmem:[%s763_s0 + $0xc] sm:$0xf]  ;;  %v424_v40 = vor.u32 %v567_v33, %v423_v32  ;;  %v428_v41 = vor.u32 %v565_v34, %v425_v35  ;;  %v432_v42 = vor.u32 %v568_v37, %v431_v36  ;;  %v32_v44 = vld [vmem:[%s763_s0 + $0x20] sm:$0xff] }
   0xf   :  { %345 = vmatpush.bf16.msra.mxu1 %v581_v13  ;;  %v436_v43 = vor.u32 %v566_v38, %v433_v39  ;;  %v33_v45 = vld [vmem:[%s763_s0 + $0x28] sm:$0xff]  ;;  %v112_v46 = vunpack.c.l.b16 %v32_v44  ;;  %v113_v47 = vunpack.c.h.b16 %v32_v44  ;;  %v606_v62 = vld [vmem:[%s764_s2] ss:$0 sm:$0xff] }
  0x10   :  { %363 = vmatpush.bf16.msra.mxu2 %v589_v14  ;;  %v114_v48 = vunpack.c.l.b16 %v33_v45  ;;  %v115_v49 = vunpack.c.h.b16 %v33_v45 }
  0x11   :  { %381 = vmatpush.bf16.msra.mxu3 %v597_v15  ;;  %v120_v50 = vpack.c.b16 %v112_v46, %v112_v46  ;;  %v121_v51 = vpack.c.b16 %v113_v47, %v113_v47 }
  0x12   :  { %328 = vmatpush.bf16.msra.mxu0 %v572_v16  ;;  %v122_v52 = vpack.c.b16 %v114_v48, %v114_v48  ;;  %v123_v53 = vpack.c.b16 %v115_v49, %v115_v49 }
  0x13   :  { %346 = vmatpush.bf16.msra.mxu1 %v580_v17 }
  0x14   :  { %364 = vmatpush.bf16.msra.mxu2 %v588_v18 }
  0x15   :  { %382 = vmatpush.bf16.msra.mxu3 %v596_v19 }
  0x16   :  { %329 = vmatpush.bf16.msra.mxu0 %v571_v20 }
  0x17   :  { %347 = vmatpush.bf16.msra.mxu1 %v579_v21 }
  0x18   :  { %365 = vmatpush.bf16.msra.mxu2 %v587_v22 }
  0x19   :  { %383 = vmatpush.bf16.msra.mxu3 %v595_v23 }
  0x1a   :  { %330 = vmatpush.bf16.msra.mxu0 %v570_v24 }
  0x1b   :  { %348 = vmatpush.bf16.msra.mxu1 %v578_v25 }
  0x1c   :  { %366 = vmatpush.bf16.msra.mxu2 %v586_v26 }
  0x1d   :  { %384 = vmatpush.bf16.msra.mxu3 %v594_v27 }
  0x1e   :  { %331 = vmatpush.bf16.msra.mxu0 %v569_v28 }
  0x1f   :  { %349 = vmatpush.bf16.msra.mxu1 %v577_v29 }
  0x20   :  { %367 = vmatpush.bf16.msra.mxu2 %v585_v30 }
  0x21   :  { %385 = vmatpush.bf16.msra.mxu3 %v593_v31  ;;  %332 = vmatmul.bf16.vlgmr.msra.gmra.mxu0 %v424_v40 }
  0x22   :  { %350 = vmatmul.bf16.vlgmr.msra.gmra.mxu1 %v428_v41 }
  0x23   :  { %368 = vmatmul.bf16.vlgmr.msra.gmra.mxu2 %v432_v42 }
  0x24   :  { %386 = vmatmul.bf16.vlgmr.msra.gmra.mxu3 %v436_v43 }
  0x31   :  { %337 = vmatmul.bf16.gmra.mxu0 %v120_v50 }
  0x32   :  { %355 = vmatmul.bf16.gmra.mxu1 %v121_v51 }
  0x33   :  { %373 = vmatmul.bf16.gmra.mxu2 %v122_v52 }
  0x34   :  { %391 = vmatmul.bf16.gmra.mxu3 %v123_v53 }
  0x9e   :  { %v333_v54 = vpop.f32.mrf.mxu0 }
  0x9f   :  { %v351_v55 = vpop.f32.mrf.mxu1 }
  0xa0   :  { %v352_v56 = vadd.f32 %v351_v55, %v333_v54 }
  0xa6   :  { %v369_v57 = vpop.f32.mrf.mxu2  ;;  %v335_v59 = vpop.f32.mrf.mxu0 }
  0xa7   :  { %v387_v58 = vpop.f32.mrf.mxu3  ;;  %v353_v60 = vpop.f32.mrf.mxu1  ;;  %v370_v61 = vadd.f32 %v369_v57, %v352_v56 }
  0xa8   :  { %v354_v0 = vadd.f32 %v353_v60, %v335_v59 }
  0xa9   :  { %v388_v63 = vadd.f32 %v387_v58, %v370_v61 }
  0xab   :  { %v396_v6 = vadd.f32 %v606_v62, %v388_v63 }
  0xad   :  { %v408_v10 = vmax.f32 %v396_v6, 0.0 }
  0xae   :  { %v371_v1 = vpop.f32.mrf.mxu2  ;;  %v338_v4 = vpop.f32.mrf.mxu0 }
  0xaf   :  { %v389_v2 = vpop.f32.mrf.mxu3  ;;  %v372_v3 = vadd.f32 %v371_v1, %v354_v0  ;;  %v356_v5 = vpop.f32.mrf.mxu1 }
  0xb0   :  { %v357_v9 = vadd.f32 %v356_v5, %v338_v4 }
  0xb1   :  { %v390_v7 = vadd.f32 %v389_v2, %v372_v3 }
  0xb3   :  { %v397_v8 = vadd.f32 %v606_v62, %v390_v7 }
  0xb5   :  { %v409_v11 = vmax.f32 %v397_v8, 0.0 }
  0xb6   :  { %v374_v12 = vpop.f32.mrf.mxu2  ;;  %v340_v16 = vpop.f32.mrf.mxu0 }
  0xb7   :  { %v392_v13 = vpop.f32.mrf.mxu3  ;;  %v604_v14 = vpack.c.bf16 %v409_v11, %v408_v10  ;;  %v375_v15 = vadd.f32 %v374_v12, %v357_v9  ;;  %v358_v17 = vpop.f32.mrf.mxu1 }
  0xb9   :  { %v393_v18 = vadd.f32 %v392_v13, %v375_v15  ;;  %605 = vst [vmem:[%s765_s3] sm:$0xff] %v604_v14  }
  0xbb   :  { %v398_v19 = vadd.f32 %v606_v62, %v393_v18 }
  0xbd   :  { %v410_v20 = vmax.f32 %v398_v19, 0.0 }
  0xbe   :  { %v376_v21 = vpop.f32.mrf.mxu2 }
  0xbf   :  { %v394_v22 = vpop.f32.mrf.mxu3  ;;  %v413_v23 = vpack.c.bf16 %v410_v20, %v410_v20 }
  0xc1   :  { %416 = vst [vmem:[%s765_s3 + $0x8] sm:$0xf] %v413_v23 }

// kernel: atari_dqn_forward.7
= control target key start
LH: loop header
LB: loop body
LE: loop exit
PB: predicated region body
PF: predicated region fallthrough
CT: control target
= control target key end

     0   :  { %s579_s12 = smov 0   ;;  %s581_s13 = smov 0   ;;  %s625_s0 = inlined_call_operand.vmem [shape: bf16[8,640], index: 0, kind: input, shape index: {}]   ;;  %s626_s1 = inlined_call_operand.vmem [shape: bf16[640,128], index: 1, kind: input, shape index: {}]   ;;  %s627_s2 = inlined_call_operand.vmem [shape: f32[1,128], index: 2, kind: input, shape index: {}]   ;;  %s628_s3 = inlined_call_operand.vmem [shape: bf16[8,128], index: 3, kind: output, shape index: {}]  }
   0x1   :  { %s583_s14 = smov 0  }
   0x2 LB: > { %s25_s15 = sadd.s32 1, %s553_s13  ;;  %p461_p0 = scmp.ge.s32.totalorder %s557_s14, 1  ;;  %s557_s14 = sphi %s583_s14, %s13_s14   ;;  %s553_s13 = sphi %s581_s13, %s630_s13   ;;  %s549_s12 = sphi %s579_s12, %s629_s12  }
   0x3   : > { %p26_p1 = scmp.ge.s32.totalorder %s25_s15, 5  ;;  %p187_p2 = scmp.lt.s32.totalorder %s557_s14, 6 }
   0x5   : > { %s632_s15 = smov (%p26_p1, %s25_s15), 0  ;;  %p188_p3 = pnand %p461_p0, %p187_p2 }
   0x6   : > { %p229_p4 = scmp.lt.s32.totalorder (!%p188_p3), %s549_s12, 4  ;;  %s463_s16 = sshll.u32 (!%p188_p3), %s549_s12, 4 }
   0x7   : > { %191 = sbr.rel (%p188_p3) target bundleno = 193 (0xc1), region = 32  ;;  %p236_p5 = scmp.lt.s32.totalorder (!%p188_p3), %s463_s16, 79 }
   0x8   : > { %p465_p6 = scmp.ne.s32.totalorder (!%p188_p3), %s549_s12, 0 }
   0xc   : > { %s230_s17 = scalar_select %p229_p4, %s549_s12, 4 }
   0xd   : > { %s634_s16 = smov (!%p236_p5, %s463_s16), 79  ;;  %257 = sbr.rel (%p465_p6) target bundleno = 20 (0x14), region = 36 }
   0xe   : > { %s462_s18 = sshll.u32 %s230_s17, 2  ;;  %s464_s22 = sshll.u32 %s634_s16, 2 }
   0xf   : > { %s234_s21 = scalar_lea.vmem %s625_s0, %s462_s18  ;;  %s242_s25 = scalar_lea.vmem %s626_s1, %s464_s22 }
  0x12   : > { %v534_v0 = vld [vmem:[%s627_s2] ss:$0 sm:$0xff] }
  0x13   : > { %262 = vst [vmem:[#allocation2] sm:$0xff] %v534_v0 }
  0x14 PF: > { %v509_v1 = vld [vmem:[%s242_s25 + $0x38] sm:$0xff]  ;;  %v508_v2 = vld [vmem:[%s242_s25 + $0x30] sm:$0xff]  ;;  %v507_v3 = vld [vmem:[%s242_s25 + $0x28] sm:$0xff]  ;;  %p498_p7 = scmp.ne.s32.totalorder %s549_s12, 4 }
  0x15   : > { %329 = vmatpush.bf16.msra.mxu0 %v509_v1  ;;  %v506_v4 = vld [vmem:[%s242_s25 + $0x20] sm:$0xff]  ;;  %v505_v5 = vld [vmem:[%s242_s25 + $0x18] sm:$0xff]  ;;  %v504_v6 = vld [vmem:[%s242_s25 + $0x10] sm:$0xff] }
  0x16   : > { %v503_v7 = vld [vmem:[%s242_s25 + $0x8] sm:$0xff]  ;;  %v502_v8 = vld [vmem:[%s242_s25] sm:$0xff] }
  0x17   : > { %v264_v9 = vld [vmem:[%s234_s21] sm:$0xf] }
  0x19   : > { %330 = vmatpush.bf16.msra.mxu0 %v508_v2 }
  0x1a   : > { %v263_v10 = vld [vmem:[#allocation2] sm:$0xff] }
  0x1d   : > { %331 = vmatpush.bf16.msra.mxu0 %v507_v3 }
  0x21   : > { %332 = vmatpush.bf16.msra.mxu0 %v506_v4 }
  0x25   : > { %333 = vmatpush.bf16.msra.mxu0 %v505_v5 }
  0x29   : > { %334 = vmatpush.bf16.msra.mxu0 %v504_v6 }
  0x2d   : > { %335 = vmatpush.bf16.msra.mxu0 %v503_v7 }
  0x31   : > { %336 = vmatpush.bf16.msra.mxu0 %v502_v8 }
  0x34   : > { %337 = vmatmul.bf16.vlgmr.msra.gmra.mxu0 %v264_v9 }
  0xb1   : > { %v338_v11 = vpop.f32.mrf.mxu0 }
  0xb2   : > { %v342_v12 = vadd.f32 %v338_v11, %v263_v10 }
  0xb4   : > { %343 = vst [vmem:[#allocation2] sm:$0xff] %v342_v12 }
  0xb5   : > { %347 = sbr.rel (%p498_p7) target bundleno = 193 (0xc1), region = 40 }
  0xb9   : > { %v340_v13 = vpop.f32.mrf.mxu0 }
  0xbb   : > { %v348_v14 = vld [vmem:[#allocation2] sm:$0xff] }
  0xbc   : > { %v349_v15 = vmax.f32 %v348_v14, 0.0 }
  0xbe   : > { %v350_v16 = vpack.c.bf16 %v349_v15, %v349_v15 }
  0xc0   : > { %351 = vst [vmem:[%s628_s3] sm:$0xf] %v350_v16 }
  0xc1 PF: > { %s13_s14 = sadd.s32 1, %s557_s14   ;;  %s629_s12 = smov %s553_s13 }
  0xc2   : > { %p10_p8 = scmp.ge.s32.totalorder %s13_s14, 7   ;;  %s630_s13 = smov %s632_s15 }
  0xc4   :  { %12 = sbr.rel (!%p10_p8) target bundleno = 2 (0x2), region = 76 }

// kernel: atari_dqn_forward.8
= control target key start
LH: loop header
LB: loop body
LE: loop exit
PB: predicated region body
PF: predicated region fallthrough
CT: control target
= control target key end

     0   :  { %s817_s12 = smov 0   ;;  %s819_s13 = smov 0   ;;  %s940_s0 = inlined_call_operand.vmem [shape: bf16[8,128], index: 0, kind: input, shape index: {}]   ;;  %s941_s1 = inlined_call_operand.vmem [shape: bf16[128,512], index: 1, kind: input, shape index: {}]   ;;  %s942_s2 = inlined_call_operand.vmem [shape: f32[1,512], index: 2, kind: input, shape index: {}]   ;;  %s943_s3 = inlined_call_operand.vmem [shape: bf16[8,512], index: 3, kind: output, shape index: {}]  }
   0x1   :  { %s821_s14 = smov 0   ;;  %s823_s15 = smov 0  }
   0x2   :  { %s825_s16 = smov 0  }
   0x3 LB: > { %s28_s17 = sadd.s32 1, %s791_s15  ;;  %p76_p1 = scmp.ne.s32.totalorder %s783_s13, %s779_s12  ;;  %s795_s16 = sphi %s825_s16, %s13_s16   ;;  %s791_s15 = sphi %s823_s15, %s947_s15   ;;  %s787_s14 = sphi %s821_s14, %s946_s14   ;;  %s783_s13 = sphi %s819_s13, %s945_s13   ;;  %s779_s12 = sphi %s817_s12, %s944_s12  }
   0x4   : > { %p30_p0 = scmp.ge.s32.totalorder %s28_s17, 2  ;;  %p77_p2 = scmp.eq.s32.totalorder %s795_s16, 0 }
   0x5   : > { %s69_s19 = sadd.s32 1, %s783_s13  ;;  %p625_p5 = scmp.ge.s32.totalorder %s795_s16, 2 }
   0x6   : > { %s949_s17 = smov (%p30_p0, %s28_s17), 0  ;;  %p78_p3 = por %p77_p2, %p76_p1 }
   0x7   : > { %s65_s18 = ssub.s32 %s791_s15, %s949_s17  ;;  %166 = sbr.rel (%p625_p5) target bundleno = 32 (0x20), region = 20 }
   0x8   : > { %p67_p4 = scmp.eq.s32.totalorder %s65_s18, 0 }
   0xa   : > { %s852_s20 = scalar_select %p67_p4, %s783_s13, %s69_s19  }
   0xc   : > { %169 = sbr.rel (!%p78_p3) target bundleno = 32 (0x20), region = 24  ;;  %s171_s21 = sand.u32 (%p78_p3), 1, %s783_s13  }
   0xd   : > { %s700_s22 = sshll.u32 (%p78_p3), %s791_s15, 3  ;;  %s626_s23 = sshll.u32 (%p78_p3), %s171_s21, 7 }
   0xe   : > { %s860_s26 = scalar_lea.vmem (%p78_p3), %s941_s1, %s700_s22  ;;  %s173_s27 = scalar_lea.vmem (%p78_p3), [#allocation3], %s626_s23 }
   0xf   : > { %v238_v0 = vld [vmem:[%s860_s26] sm:$0xff] (%p78_p3)  ;;  %v240_v1 = vld [vmem:[%s860_s26 + $0x10] sm:$0xff] (%p78_p3) }
  0x10   : > { %v242_v2 = vld [vmem:[%s860_s26 + $0x20] sm:$0xff] (%p78_p3)  ;;  %239 = vst [vmem:[%s173_s27] sm:$0xff] (%p78_p3), %v238_v0  ;;  %v244_v3 = vld [vmem:[%s860_s26 + $0x30] sm:$0xff] (%p78_p3) }
  0x11   : > { %241 = vst [vmem:[%s173_s27 + $0x8] sm:$0xff] %v240_v1  ;;  %v246_v4 = vld [vmem:[%s860_s26 + $0x40] sm:$0xff]  ;;  %v248_v5 = vld [vmem:[%s860_s26 + $0x50] sm:$0xff] }
  0x12   : > { %243 = vst [vmem:[%s173_s27 + $0x10] sm:$0xff] %v242_v2  ;;  %v250_v6 = vld [vmem:[%s860_s26 + $0x60] sm:$0xff]  ;;  %v252_v7 = vld [vmem:[%s860_s26 + $0x70] sm:$0xff] }
  0x13   : > { %245 = vst [vmem:[%s173_s27 + $0x18] sm:$0xff] %v244_v3  ;;  %v254_v8 = vld [vmem:[%s860_s26 + $0x80] sm:$0xff]  ;;  %v256_v9 = vld [vmem:[%s860_s26 + $0x90] sm:$0xff] }
  0x14   : > { %247 = vst [vmem:[%s173_s27 + $0x20] sm:$0xff] %v246_v4  ;;  %v258_v10 = vld [vmem:[%s860_s26 + $0xa0] sm:$0xff]  ;;  %v260_v11 = vld [vmem:[%s860_s26 + $0xb0] sm:$0xff] }
  0x15   : > { %249 = vst [vmem:[%s173_s27 + $0x28] sm:$0xff] %v248_v5  ;;  %v262_v12 = vld [vmem:[%s860_s26 + $0xc0] sm:$0xff]  ;;  %v264_v13 = vld [vmem:[%s860_s26 + $0xd0] sm:$0xff] }
  0x16   : > { %251 = vst [vmem:[%s173_s27 + $0x30] sm:$0xff] %v250_v6  ;;  %v266_v14 = vld [vmem:[%s860_s26 + $0xe0] sm:$0xff]  ;;  %v268_v15 = vld [vmem:[%s860_s26 + $0xf0] sm:$0xff] }
  0x17   : > { %253 = vst [vmem:[%s173_s27 + $0x38] sm:$0xff] %v252_v7 }
  0x18   : > { %255 = vst [vmem:[%s173_s27 + $0x40] sm:$0xff] %v254_v8 }
  0x19   : > { %257 = vst [vmem:[%s173_s27 + $0x48] sm:$0xff] %v256_v9 }
  0x1a   : > { %259 = vst [vmem:[%s173_s27 + $0x50] sm:$0xff] %v258_v10 }
  0x1b   : > { %261 = vst [vmem:[%s173_s27 + $0x58] sm:$0xff] %v260_v11 }
  0x1c   : > { %263 = vst [vmem:[%s173_s27 + $0x60] sm:$0xff] %v262_v12 }
  0x1d   : > { %265 = vst [vmem:[%s173_s27 + $0x68] sm:$0xff] %v264_v13 }
  0x1e   : > { %267 = vst [vmem:[%s173_s27 + $0x70] sm:$0xff] %v266_v14 }
  0x1f   : > { %269 = vst [vmem:[%s173_s27 + $0x78] sm:$0xff] %v268_v15 }
  0x20 PF: > { %p629_p6 = scmp.ge.s32.totalorder %s795_s16, 1  ;;  %p282_p7 = scmp.lt.s32.totalorder %s795_s16, 3 }
  0x22   : > { %p283_p8 = pnand %p629_p6, %p282_p7 }
  0x23   : > { %s289_s28 = sand.u32 (!%p283_p8), 1, %s779_s12   ;;  %s631_s6 = sshll.u32 (!%p283_p8), %s787_s14, 1 }
  0x24   : > { %286 = sbr.rel (%p283_p8) target bundleno = 210 (0xd2), region = 66  ;;  %s630_s29 = sshll.u32 (!%p283_p8), %s289_s28, 7 }
  0x25   : > { %s881_s30 = scalar_lea.vmem (!%p283_p8), [#allocation3], %s630_s29  ;;  %p337_p9 = scmp.lt.s32.totalorder (!%p283_p8), %s631_s6, 3 }
  0x29   : > { %v692_v16 = vld [vmem:[%s881_s30 + $0x70] sm:$0xf]  ;;  %v716_v17 = vld [vmem:[%s881_s30 + $0x74] sm:$0xf0]  ;;  %v715_v18 = vld [vmem:[%s881_s30 + $0x74] sm:$0xf] }
  0x2a   : > { %v693_v19 = vor.u32 %v716_v17, %v692_v16  ;;  %v694_v20 = vld [vmem:[%s881_s30 + $0x78] sm:$0xf0]  ;;  %v684_v21 = vld [vmem:[%s881_s30 + $0x60] sm:$0xf]  ;;  %v714_v22 = vld [vmem:[%s881_s30 + $0x64] sm:$0xf0] }
  0x2b   : > { %v697_v23 = vor.u32 %v715_v18, %v694_v20  ;;  %v713_v24 = vld [vmem:[%s881_s30 + $0x64] sm:$0xf]  ;;  %v686_v25 = vld [vmem:[%s881_s30 + $0x68] sm:$0xf0]  ;;  %v685_v26 = vor.u32 %v714_v22, %v684_v21  ;;  %v676_v28 = vld [vmem:[%s881_s30 + $0x50] sm:$0xf] }
  0x2c   : > { %462 = vmatpush.bf16.msra.mxu0 %v693_v19  ;;  %v689_v27 = vor.u32 %v713_v24, %v686_v25  ;;  %v712_v29 = vld [vmem:[%s881_s30 + $0x54] sm:$0xf0]  ;;  %v711_v30 = vld [vmem:[%s881_s30 + $0x54] sm:$0xf]  ;;  %v678_v31 = vld [vmem:[%s881_s30 + $0x58] sm:$0xf0] }
  0x2d   : > { %475 = vmatpush.bf16.msra.mxu1 %v697_v23  ;;  %v677_v32 = vor.u32 %v712_v29, %v676_v28  ;;  %v681_v33 = vor.u32 %v711_v30, %v678_v31  ;;  %v668_v34 = vld [vmem:[%s881_s30 + $0x40] sm:$0xf]  ;;  %v710_v35 = vld [vmem:[%s881_s30 + $0x44] sm:$0xf0]  ;;  %v709_v36 = vld [vmem:[%s881_s30 + $0x44] sm:$0xf] }
  0x2e   : > { %v670_v37 = vld [vmem:[%s881_s30 + $0x48] sm:$0xf0]  ;;  %v669_v38 = vor.u32 %v710_v35, %v668_v34  ;;  %v660_v40 = vld [vmem:[%s881_s30 + $0x30] sm:$0xf]  ;;  %v708_v41 = vld [vmem:[%s881_s30 + $0x34] sm:$0xf0] }
  0x2f   : > { %v673_v39 = vor.u32 %v709_v36, %v670_v37  ;;  %v707_v42 = vld [vmem:[%s881_s30 + $0x34] sm:$0xf]  ;;  %v662_v43 = vld [vmem:[%s881_s30 + $0x38] sm:$0xf0]  ;;  %v661_v44 = vor.u32 %v708_v41, %v660_v40  ;;  %v652_v46 = vld [vmem:[%s881_s30 + $0x20] sm:$0xf] }
  0x30   : > { %463 = vmatpush.bf16.msra.mxu0 %v685_v26  ;;  %v665_v45 = vor.u32 %v707_v42, %v662_v43  ;;  %v706_v47 = vld [vmem:[%s881_s30 + $0x24] sm:$0xf0]  ;;  %v705_v48 = vld [vmem:[%s881_s30 + $0x24] sm:$0xf]  ;;  %v654_v49 = vld [vmem:[%s881_s30 + $0x28] sm:$0xf0] }
  0x31   : > { %476 = vmatpush.bf16.msra.mxu1 %v689_v27  ;;  %v653_v50 = vor.u32 %v706_v47, %v652_v46  ;;  %v657_v51 = vor.u32 %v705_v48, %v654_v49  ;;  %v644_v52 = vld [vmem:[%s881_s30 + $0x10] sm:$0xf]  ;;  %v704_v53 = vld [vmem:[%s881_s30 + $0x14] sm:$0xf0]  ;;  %v703_v54 = vld [vmem:[%s881_s30 + $0x14] sm:$0xf] }
  0x32   : > { %v646_v55 = vld [vmem:[%s881_s30 + $0x18] sm:$0xf0]  ;;  %v645_v56 = vor.u32 %v704_v53, %v644_v52  ;;  %v636_v58 = vld [vmem:[%s881_s30] sm:$0xf]  ;;  %v702_v59 = vld [vmem:[%s881_s30 + $0x4] sm:$0xf0] }
  0x33   : > { %v649_v57 = vor.u32 %v703_v54, %v646_v55  ;;  %v701_v60 = vld [vmem:[%s881_s30 + $0x4] sm:$0xf]  ;;  %v638_v61 = vld [vmem:[%s881_s30 + $0x8] sm:$0xf0]  ;;  %v637_v62 = vor.u32 %v702_v59, %v636_v58  ;;  %v365_v0 = vld [vmem:[%s940_s0] sm:$0xf] }
  0x34   : > { %464 = vmatpush.bf16.msra.mxu0 %v677_v32  ;;  %v641_v63 = vor.u32 %v701_v60, %v638_v61  ;;  %s951_s6 = smov (!%p337_p9, %s631_s6), 3 }
  0x35   : > { %477 = vmatpush.bf16.msra.mxu1 %v681_v33  ;;  %s339_s9 = scalar_lea.vmem %s942_s2, %s951_s6  ;;  %s633_s10 = sshll.u32 %s951_s6, 2 }
  0x36   : > { %v355_v1 = vld [vmem:[%s339_s9] sm:$0x3]  ;;  %s349_s14 = scalar_lea.vmem %s943_s3, %s633_s10 }
  0x37   : > { %v357_v2 = vperm.slane %v355_v1, 0  ;;  %v358_v3 = vperm.slane %v355_v1, 1 }
  0x38   : > { %465 = vmatpush.bf16.msra.mxu0 %v669_v38 }
  0x39   : > { %478 = vmatpush.bf16.msra.mxu1 %v673_v39 }
  0x3c   : > { %466 = vmatpush.bf16.msra.mxu0 %v661_v44 }
  0x3d   : > { %479 = vmatpush.bf16.msra.mxu1 %v665_v45 }
  0x40   : > { %467 = vmatpush.bf16.msra.mxu0 %v653_v50 }
  0x41   : > { %480 = vmatpush.bf16.msra.mxu1 %v657_v51 }
  0x44   : > { %468 = vmatpush.bf16.msra.mxu0 %v645_v56 }
  0x45   : > { %481 = vmatpush.bf16.msra.mxu1 %v649_v57 }
  0x48   : > { %469 = vmatpush.bf16.msra.mxu0 %v637_v62 }
  0x49   : > { %482 = vmatpush.bf16.msra.mxu1 %v641_v63 }
  0x4b   : > { %470 = vmatmul.bf16.vlgmr.msra.gmra.mxu0 %v365_v0 }
  0x4c   : > { %483 = vmatmul.bf16.vlgmr.msra.gmra.mxu1 %v365_v0 }
  0xc8   : > { %v471_v4 = vpop.f32.mrf.mxu0 }
  0xc9   : > { %v488_v5 = vadd.f32 %v471_v4, %v357_v2  ;;  %v484_v6 = vpop.f32.mrf.mxu1 }
  0xca   : > { %v489_v7 = vadd.f32 %v484_v6, %v358_v3 }
  0xcb   : > { %v497_v8 = vmax.f32 %v488_v5, 0.0 }
  0xcc   : > { %v498_v9 = vmax.f32 %v489_v7, 0.0 }
  0xce   : > { %v499_v10 = vpack.c.bf16 %v498_v9, %v497_v8 }
  0xd0   : > { %500 = vst [vmem:[%s349_s14] sm:$0xff] %v499_v10  ;;  %v473_v11 = vpop.f32.mrf.mxu0 }
  0xd1   : > { %v486_v12 = vpop.f32.mrf.mxu1 }
  0xd2 PF: > { %s13_s16 = sadd.s32 1, %s795_s16   ;;  %s944_s12 = smov %s783_s13 }
  0xd3   : > { %p10_p10 = scmp.ge.s32.totalorder %s13_s16, 4   ;;  %s945_s13 = smov %s852_s20 }
  0xd4   : > { %s946_s14 = smov %s791_s15  ;;  %s947_s15 = smov %s949_s17 }
  0xd5   :  { %12 = sbr.rel (!%p10_p10) target bundleno = 3 (0x3), region = 119 }

// kernel: atari_dqn_forward.9
= control target key start
LH: loop header
LB: loop body
LE: loop exit
PB: predicated region body
PF: predicated region fallthrough
CT: control target
= control target key end

     0   :  { %s648_s1 = inlined_call_operand.vmem [shape: bf16[512,128], index: 1, kind: input, shape index: {}]   ;;  %s649_s0 = inlined_call_operand.vmem [shape: bf16[8,512], index: 0, kind: input, shape index: {}]   ;;  %s650_s2 = inlined_call_operand.vmem [shape: f32[1,128], index: 2, kind: input, shape index: {}]   ;;  %s651_s3 = inlined_call_operand.vmem [shape: f32[8,128], index: 3, kind: output, shape index: {}]  }
   0x1   :  { %v494_v0 = vld [vmem:[%s648_s1 + $0x38] sm:$0xff]  ;;  %v493_v4 = vld [vmem:[%s648_s1 + $0x30] sm:$0xff]  ;;  %v492_v8 = vld [vmem:[%s648_s1 + $0x28] sm:$0xff] }
   0x2   :  { %v502_v1 = vld [vmem:[%s648_s1 + $0x78] sm:$0xff]  ;;  %296 = vmatpush.bf16.msra.mxu0 %v494_v0  ;;  %v501_v5 = vld [vmem:[%s648_s1 + $0x70] sm:$0xff]  ;;  %v500_v9 = vld [vmem:[%s648_s1 + $0x68] sm:$0xff] }
   0x3   :  { %v510_v2 = vld [vmem:[%s648_s1 + $0xb8] sm:$0xff]  ;;  %309 = vmatpush.bf16.msra.mxu1 %v502_v1  ;;  %v509_v6 = vld [vmem:[%s648_s1 + $0xb0] sm:$0xff]  ;;  %v508_v10 = vld [vmem:[%s648_s1 + $0xa8] sm:$0xff] }
   0x4   :  { %v518_v3 = vld [vmem:[%s648_s1 + $0xf8] sm:$0xff]  ;;  %322 = vmatpush.bf16.msra.mxu2 %v510_v2  ;;  %v517_v7 = vld [vmem:[%s648_s1 + $0xf0] sm:$0xff]  ;;  %v516_v11 = vld [vmem:[%s648_s1 + $0xe8] sm:$0xff] }
   0x5   :  { %335 = vmatpush.bf16.msra.mxu3 %v518_v3  ;;  %v491_v12 = vld [vmem:[%s648_s1 + $0x20] sm:$0xff]  ;;  %v490_v16 = vld [vmem:[%s648_s1 + $0x18] sm:$0xff]  ;;  %v489_v20 = vld [vmem:[%s648_s1 + $0x10] sm:$0xff] }
   0x6   :  { %297 = vmatpush.bf16.msra.mxu0 %v493_v4  ;;  %v499_v13 = vld [vmem:[%s648_s1 + $0x60] sm:$0xff]  ;;  %v498_v17 = vld [vmem:[%s648_s1 + $0x58] sm:$0xff]  ;;  %v497_v21 = vld [vmem:[%s648_s1 + $0x50] sm:$0xff] }
   0x7   :  { %310 = vmatpush.bf16.msra.mxu1 %v501_v5  ;;  %v507_v14 = vld [vmem:[%s648_s1 + $0xa0] sm:$0xff]  ;;  %v506_v18 = vld [vmem:[%s648_s1 + $0x98] sm:$0xff]  ;;  %v505_v22 = vld [vmem:[%s648_s1 + $0x90] sm:$0xff] }
   0x8   :  { %323 = vmatpush.bf16.msra.mxu2 %v509_v6  ;;  %v515_v15 = vld [vmem:[%s648_s1 + $0xe0] sm:$0xff]  ;;  %v514_v19 = vld [vmem:[%s648_s1 + $0xd8] sm:$0xff]  ;;  %v513_v23 = vld [vmem:[%s648_s1 + $0xd0] sm:$0xff] }
   0x9   :  { %336 = vmatpush.bf16.msra.mxu3 %v517_v7  ;;  %v488_v24 = vld [vmem:[%s648_s1 + $0x8] sm:$0xff]  ;;  %v24_v26 = vld [vmem:[%s649_s0] sm:$0xff] }
   0xa   :  { %298 = vmatpush.bf16.msra.mxu0 %v492_v8  ;;  %v496_v25 = vld [vmem:[%s648_s1 + $0x48] sm:$0xff]  ;;  %v92_v30 = vunpack.c.l.b16 %v24_v26  ;;  %v93_v31 = vunpack.c.h.b16 %v24_v26  ;;  %v487_v32 = vld [vmem:[%s648_s1] sm:$0xff] }
   0xb   :  { %311 = vmatpush.bf16.msra.mxu1 %v500_v9  ;;  %v504_v27 = vld [vmem:[%s648_s1 + $0x88] sm:$0xff]  ;;  %v495_v33 = vld [vmem:[%s648_s1 + $0x40] sm:$0xff] }
   0xc   :  { %324 = vmatpush.bf16.msra.mxu2 %v508_v10  ;;  %v512_v28 = vld [vmem:[%s648_s1 + $0xc8] sm:$0xff]  ;;  %v503_v36 = vld [vmem:[%s648_s1 + $0x80] sm:$0xff]  ;;  %v96_v38 = vpack.c.b16 %v92_v30, %v92_v30  ;;  %v97_v39 = vpack.c.b16 %v93_v31, %v93_v31 }
   0xd   :  { %337 = vmatpush.bf16.msra.mxu3 %v516_v11  ;;  %v25_v29 = vld [vmem:[%s649_s0 + $0x8] sm:$0xff]  ;;  %v511_v37 = vld [vmem:[%s648_s1 + $0xc0] sm:$0xff] }
   0xe   :  { %299 = vmatpush.bf16.msra.mxu0 %v491_v12  ;;  %v94_v34 = vunpack.c.l.b16 %v25_v29  ;;  %v95_v35 = vunpack.c.h.b16 %v25_v29  ;;  %v519_v48 = vld [vmem:[%s650_s2] ss:$0 sm:$0xff] }
   0xf   :  { %312 = vmatpush.bf16.msra.mxu1 %v499_v13 }
  0x10   :  { %325 = vmatpush.bf16.msra.mxu2 %v507_v14  ;;  %v98_v40 = vpack.c.b16 %v94_v34, %v94_v34  ;;  %v99_v41 = vpack.c.b16 %v95_v35, %v95_v35 }
  0x11   :  { %338 = vmatpush.bf16.msra.mxu3 %v515_v15 }
  0x12   :  { %300 = vmatpush.bf16.msra.mxu0 %v490_v16 }
  0x13   :  { %313 = vmatpush.bf16.msra.mxu1 %v498_v17 }
  0x14   :  { %326 = vmatpush.bf16.msra.mxu2 %v506_v18 }
  0x15   :  { %339 = vmatpush.bf16.msra.mxu3 %v514_v19 }
  0x16   :  { %301 = vmatpush.bf16.msra.mxu0 %v489_v20 }
  0x17   :  { %314 = vmatpush.bf16.msra.mxu1 %v497_v21 }
  0x18   :  { %327 = vmatpush.bf16.msra.mxu2 %v505_v22 }
  0x19   :  { %340 = vmatpush.bf16.msra.mxu3 %v513_v23 }
  0x1a   :  { %302 = vmatpush.bf16.msra.mxu0 %v488_v24 }
  0x1b   :  { %315 = vmatpush.bf16.msra.mxu1 %v496_v25 }
  0x1c   :  { %328 = vmatpush.bf16.msra.mxu2 %v504_v27 }
  0x1d   :  { %341 = vmatpush.bf16.msra.mxu3 %v512_v28 }
  0x1e   :  { %303 = vmatpush.bf16.msra.mxu0 %v487_v32 }
  0x1f   :  { %316 = vmatpush.bf16.msra.mxu1 %v495_v33 }
  0x20   :  { %329 = vmatpush.bf16.msra.mxu2 %v503_v36 }
  0x21   :  { %342 = vmatpush.bf16.msra.mxu3 %v511_v37  ;;  %304 = vmatmul.bf16.vlgmr.msra.gmra.mxu0 %v96_v38 }
  0x22   :  { %317 = vmatmul.bf16.vlgmr.msra.gmra.mxu1 %v97_v39 }
  0x23   :  { %330 = vmatmul.bf16.vlgmr.msra.gmra.mxu2 %v98_v40 }
  0x24   :  { %343 = vmatmul.bf16.vlgmr.msra.gmra.mxu3 %v99_v41 }
  0x9e   :  { %v305_v42 = vpop.f32.mrf.mxu0 }
  0x9f   :  { %v318_v43 = vpop.f32.mrf.mxu1 }
  0xa0   :  { %v319_v44 = vadd.f32 %v318_v43, %v305_v42 }
  0xa6   :  { %v331_v45 = vpop.f32.mrf.mxu2  ;;  %v307_v49 = vpop.f32.mrf.mxu0 }
  0xa7   :  { %v344_v46 = vpop.f32.mrf.mxu3  ;;  %v332_v47 = vadd.f32 %v331_v45, %v319_v44  ;;  %v320_v50 = vpop.f32.mrf.mxu1 }
  0xa9   :  { %v345_v51 = vadd.f32 %v344_v46, %v332_v47 }
  0xab   :  { %v348_v52 = vadd.f32 %v519_v48, %v345_v51 }
  0xad   :  { %354 = vst [vmem:[%s651_s3] sm:$0xff] %v348_v52 }
  0xae   :  { %v333_v53 = vpop.f32.mrf.mxu2 }
  0xaf   :  { %v346_v54 = vpop.f32.mrf.mxu3 }

</bundles_post_ra>
